<compile_context>
chip_gen: v5e
topology: v5e:2x2
jax: 0.10.0
libtpu: 0.0.40
codegen_flags: <defaults>
</compile_context>

<pallas_src>
import math
from functools import partial

import jax
import jax.numpy as jnp
from jax import lax
from jax.experimental import pallas as pl
from jax.experimental.pallas import tpu as pltpu


# Above the 16/32 MiB scoped-VMEM defaults (v5e/v6e), below v7x's 64 MiB physical.
_VMEM_LIMIT_BYTES = 48 * 1024 * 1024


def _zero_map(nd):
    def idx(i):
        return (0,) * nd
    return idx


def _at_dot(a, y):
    """A^T @ y without materializing the transpose (MXU consumes `a` in place)."""
    return lax.dot_general(a, y, (((0,), (0,)), ((), ())),
                           preferred_element_type=jnp.float32)


def _asap_main_kernel(negative_slope, n_nodes, n_ch,
                      x_ref, a_ref,
                      wgcn_ref, bgcn_ref,
                      wq1_ref, bq1_ref,
                      watt2_ref, batt_ref,
                      wle_ref, ble_ref,
                      score_ref, out_ref, fit_ref):
    neg_big = jnp.float32(-1e30)
    x = x_ref[...]                    # (N, C)
    a = a_ref[...]                    # (N, N) 0/1 adjacency with self loops

    # ---- degree at edge_index[1] (column sums of a); self loops -> deg >= 1 ----
    ones_col = jnp.ones((n_nodes, 1), jnp.float32)
    deg_col = _at_dot(a, ones_col)                       # (N, 1)
    dinv = lax.rsqrt(jnp.maximum(deg_col, 1e-12))

    # ---- GCNConv (gnn_intra_cluster):
    #      x_pool[t] = d_t^-1/2 * sum_s a[s, t] * d_s^-1/2 * (xW)[s] + b ----
    xw = jnp.dot(x, wgcn_ref[...], preferred_element_type=jnp.float32)
    x_pool = _at_dot(a, xw * dinv) * dinv + bgcn_ref[...]

    # ---- shared helpers ----
    neg_mask = neg_big * (1.0 - a)    # 0 on edges, ~-1e30 on non-edges (reused twice)
    xpt = jnp.transpose(x_pool)       # (C, N): reused by scatter_max loop and s2

    # ---- fused scatter_max + lin_q + gat_att first half:
    #      X_q[i, c] = max_{j in N(i)} x_pool[j, c]
    #      s1[i] = w_att1 . (X_q[i] @ W_q + b_q)
    #            = sum_c X_q[i, c] * (W_q @ w_att1)[c] + b_q @ w_att1 ----
    wq1 = wq1_ref[...]                # (C, 1) == W_q @ w_att1 (fused on the host)
    s1 = jnp.zeros((n_nodes, 1), jnp.float32)
    # Static loop over channels (a model constant, not the graph size); each step
    # is one lane-wide (N, N) masked row-max - no O(N) trace blowup.
    for cidx in range(n_ch):
        cand = xpt[cidx:cidx + 1, :] + neg_mask          # (N, N)
        colmax = jnp.max(cand, axis=1, keepdims=True)    # (N, 1)
        s1 = s1 + colmax * wq1[cidx:cidx + 1, :]
    s1 = s1 + bq1_ref[...]            # (1, 1) == b_q @ w_att1

    # ---- GAT-style edge score + leaky_relu + per-row softmax over real edges ----
    s2 = jnp.dot(watt2_ref[...], xpt, preferred_element_type=jnp.float32)  # (1, N)
    raw = s1 + s2 + batt_ref[...]                                          # (N, N)
    act = jnp.where(raw > 0, raw, negative_slope * raw)
    masked = act + neg_mask           # non-edges pushed to ~-1e30 -> exp == 0 exactly
    row_max = jnp.max(masked, axis=1, keepdims=True)
    expv = jnp.exp(masked - row_max)
    denom = jnp.sum(expv, axis=1, keepdims=True)
    score = expv * pl.reciprocal(denom, approx=True)
    # TODO(synk): F.dropout(score, p=dropout_att) omitted (dropout_att=0 / eval).

    # ---- out[i] = sum_j score[i, j] * x[j]  (scatter_add at edge_index[0]) ----
    out = jnp.dot(score, x, preferred_element_type=jnp.float32)

    # ---- fitness = sigmoid(LEConv(out)), aggregation at edge_index[1]:
    #      fit[t] = deg_t * lin1(out_t) - sum_{s in N(t)} lin2(out_s) + lin3(out_t)
    #      (lin1/lin2/lin3 fused into one (C, 3) projection; lin2 has no bias) ----
    le = jnp.dot(out, wle_ref[...], preferred_element_type=jnp.float32) + ble_ref[...]
    a1 = le[:, 0:1]
    b2 = le[:, 1:2]
    c3 = le[:, 2:3]
    fit_pre = deg_col * a1 - _at_dot(a, b2) + c3
    fitness = pl.reciprocal(1.0 + jnp.exp(-fit_pre), approx=True)

    score_ref[...] = score
    out_ref[...] = out
    fit_ref[...] = jnp.transpose(fitness)   # lane-dense (1, N) store


def _connectivity_kernel(sp_ref, a_ref, outsel_ref, fitsel_ref, e_ref, xout_ref):
    # E = S^T A S with S[j, p] = score[perm[p], j]  ->  E = Sp @ A @ Sp^T,
    # value_A == 1 on edges (edge_weight is None in the reference), then
    # remove_self_loops + add_remaining_self_loops(fill_value=1).
    sp = sp_ref[...]                  # (k, N) = score[perm]
    a = a_ref[...]                    # (N, N)
    t = jnp.dot(sp, a, preferred_element_type=jnp.float32)                 # Sp @ A
    e = lax.dot_general(t, sp, (((1,), (1,)), ((), ())),
                        preferred_element_type=jnp.float32)                # .. @ Sp^T
    kn = e.shape[0]
    ri = lax.broadcasted_iota(jnp.int32, (kn, kn), 0)
    ci = lax.broadcasted_iota(jnp.int32, (kn, kn), 1)
    eye = (ri == ci).astype(jnp.float32)
    e_ref[...] = e * (1.0 - eye) + eye
    xout_ref[...] = outsel_ref[...] * fitsel_ref[...]   # x = out[perm] * fitness[perm]


def asap_pooling_forward(x, adj, batch, params, ratio, negative_slope=0.2):
    """Returns (x_pooled, dense pooled adjacency E, batch_pooled, perm)."""
    n, c = x.shape
    x = x.astype(jnp.float32)
    eye = jnp.eye(n, dtype=jnp.float32)
    # add_remaining_self_loops(fill_value=1); edge_weight is None -> unit weights.
    a = jnp.where((adj + eye) > 0, 1.0, 0.0).astype(jnp.float32)

    # Host-side weight fusion so the skinny (C,1) projections share MXU passes.
    w_q1 = jnp.dot(params["w_q"], params["w_att1"])            # (C, 1)
    b_q1 = jnp.dot(params["b_q"], params["w_att1"])            # (1, 1)
    w_le = jnp.concatenate([params["w_le1"], params["w_le2"], params["w_le3"]],
                           axis=1)                             # (C, 3)
    b_le = jnp.concatenate([params["b_le1"], jnp.zeros((1, 1), jnp.float32),
                            params["b_le3"]], axis=1)          # (1, 3) (lin2: no bias)

    compiler_params = pltpu.CompilerParams(
        dimension_semantics=("arbitrary",),
        vmem_limit_bytes=_VMEM_LIMIT_BYTES)

    kernel = partial(_asap_main_kernel, negative_slope, n, c)
    ins = (x, a,
           params["w_gcn"], params["b_gcn"],
           w_q1, b_q1,
           params["w_att2"], params["b_att"],
           w_le, b_le)
    in_specs = [pl.BlockSpec(t.shape, _zero_map(t.ndim)) for t in ins]
    out_shape = (jax.ShapeDtypeStruct((n, n), jnp.float32),   # edge attention scores
                 jax.ShapeDtypeStruct((n, c), jnp.float32),   # pooled cluster reps
                 jax.ShapeDtypeStruct((1, n), jnp.float32))   # fitness (lane-dense)
    out_specs = tuple(pl.BlockSpec(s.shape, _zero_map(len(s.shape))) for s in out_shape)
    score, out, fitness = pl.pallas_call(
        kernel, grid=(1,), in_specs=in_specs, out_specs=out_specs,
        out_shape=out_shape, compiler_params=compiler_params)(*ins)

    # ---- top-k selection (plain JAX glue: data-dependent gather between kernels) --
    k = int(math.ceil(ratio * n))
    fit_vec = fitness[0]                               # (N,)
    _, perm = lax.top_k(fit_vec, k)
    out_sel = out[perm]                                # (k, C)
    fit_sel = fit_vec[perm][:, None]                   # (k, 1)
    sp = score[perm, :]                                # (k, N), no transpose needed

    conn_ins = (sp, a, out_sel, fit_sel)
    conn_in_specs = [pl.BlockSpec(t.shape, _zero_map(t.ndim)) for t in conn_ins]
    conn_out_shape = (jax.ShapeDtypeStruct((k, k), jnp.float32),
                      jax.ShapeDtypeStruct((k, c), jnp.float32))
    conn_out_specs = tuple(pl.BlockSpec(s.shape, _zero_map(len(s.shape)))
                           for s in conn_out_shape)
    e_dense, x_out = pl.pallas_call(
        _connectivity_kernel, grid=(1,),
        in_specs=conn_in_specs, out_specs=conn_out_specs,
        out_shape=conn_out_shape, compiler_params=compiler_params)(*conn_ins)

    batch_out = batch[perm]
    return x_out, e_dense, batch_out, perm


def init_params(key, c):
    keys = jax.random.split(key, 12)

    def lin(k, fan_in, shape):
        bound = 1.0 / math.sqrt(fan_in)
        return jax.random.uniform(k, shape, jnp.float32, -bound, bound)

    return dict(
        # gnn_intra_cluster: GCNConv(C, C)  (weight stored as [in, out])
        w_gcn=lin(keys[0], c, (c, c)), b_gcn=lin(keys[1], c, (1, c)),
        # lin_q: Linear(C, C)
        w_q=lin(keys[2], c, (c, c)), b_q=lin(keys[3], c, (1, c)),
        # gat_att: Linear(2C, 1) split into the M_q half and the x_pool half
        w_att1=lin(keys[4], 2 * c, (c, 1)),
        w_att2=lin(keys[5], 2 * c, (1, c)),
        b_att=lin(keys[6], 2 * c, (1, 1)),
        # gnn_score: LEConv(C, 1) -> lin1 (bias), lin2 (no bias), lin3 (bias)
        w_le1=lin(keys[7], c, (c, 1)), b_le1=lin(keys[8], c, (1, 1)),
        w_le2=lin(keys[9], c, (c, 1)),
        w_le3=lin(keys[10], c, (c, 1)), b_le3=lin(keys[11], c, (1, 1)),
    )


if __name__ == "__main__":
    key = jax.random.PRNGKey(0)
    kx, kadj, kp = jax.random.split(key, 3)

    N, C, RATIO = 16, 32, 0.5
    x = jax.random.normal(kx, (N, C), jnp.float32)
    # random symmetric adjacency without self loops (forward adds remaining self loops)
    up = (jax.random.uniform(kadj, (N, N)) < 0.3).astype(jnp.float32)
    adj = jnp.triu(up, 1)
    adj = adj + adj.T
    batch = jnp.zeros((N,), jnp.int32)

    params = init_params(kp, C)
    x_out, e_dense, batch_out, perm = asap_pooling_forward(
        x, adj, batch, params, RATIO, negative_slope=0.2)
    jax.block_until_ready((x_out, e_dense, batch_out, perm))
    print("KERNEL_OK")
</pallas_src>

<mosaic_0001>
module attributes {stable_mosaic.version = 11 : i64} {
  func.func @_asap_main_kernel(%arg0: i32, %arg1: memref<16x32xf32, #tpu.memory_space<vmem>>, %arg2: memref<16x16xf32, #tpu.memory_space<vmem>>, %arg3: memref<32x32xf32, #tpu.memory_space<vmem>>, %arg4: memref<1x32xf32, #tpu.memory_space<vmem>>, %arg5: memref<32x1xf32, #tpu.memory_space<vmem>>, %arg6: memref<1x1xf32, #tpu.memory_space<vmem>>, %arg7: memref<1x32xf32, #tpu.memory_space<vmem>>, %arg8: memref<1x1xf32, #tpu.memory_space<vmem>>, %arg9: memref<32x3xf32, #tpu.memory_space<vmem>>, %arg10: memref<1x3xf32, #tpu.memory_space<vmem>>, %arg11: memref<16x16xf32, #tpu.memory_space<vmem>>, %arg12: memref<16x32xf32, #tpu.memory_space<vmem>>, %arg13: memref<1x16xf32, #tpu.memory_space<vmem>>) attributes {dimension_semantics = [#tpu.dimension_semantics<arbitrary>], iteration_bounds = array<i64: 1>, scalar_prefetch = 0 : i64, scratch_operands = 0 : i64, tpu.core_type = #tpu.core_type<tc>, window_params = [{pipeline_mode = #tpu.pipeline_mode<synchronous>, transform_indices = @transform_0, window_bounds = array<i64: 16, 32>}, {pipeline_mode = #tpu.pipeline_mode<synchronous>, transform_indices = @transform_1, window_bounds = array<i64: 16, 16>}, {pipeline_mode = #tpu.pipeline_mode<synchronous>, transform_indices = @transform_2, window_bounds = array<i64: 32, 32>}, {pipeline_mode = #tpu.pipeline_mode<synchronous>, transform_indices = @transform_3, window_bounds = array<i64: 1, 32>}, {pipeline_mode = #tpu.pipeline_mode<synchronous>, transform_indices = @transform_4, window_bounds = array<i64: 32, 1>}, {pipeline_mode = #tpu.pipeline_mode<synchronous>, transform_indices = @transform_5, window_bounds = array<i64: 1, 1>}, {pipeline_mode = #tpu.pipeline_mode<synchronous>, transform_indices = @transform_6, window_bounds = array<i64: 1, 32>}, {pipeline_mode = #tpu.pipeline_mode<synchronous>, transform_indices = @transform_7, window_bounds = array<i64: 1, 1>}, {pipeline_mode = #tpu.pipeline_mode<synchronous>, transform_indices = @transform_8, window_bounds = array<i64: 32, 3>}, {pipeline_mode = #tpu.pipeline_mode<synchronous>, transform_indices = @transform_9, window_bounds = array<i64: 1, 3>}, {pipeline_mode = #tpu.pipeline_mode<synchronous>, transform_indices = @transform_10, window_bounds = array<i64: 16, 16>}, {pipeline_mode = #tpu.pipeline_mode<synchronous>, transform_indices = @transform_11, window_bounds = array<i64: 16, 32>}, {pipeline_mode = #tpu.pipeline_mode<synchronous>, transform_indices = @transform_12, window_bounds = array<i64: 1, 16>}]} {
    %c0 = arith.constant 0 : index
    %c0_0 = arith.constant 0 : index
    %0 = vector.load %arg1[%c0, %c0_0] : memref<16x32xf32, #tpu.memory_space<vmem>>, vector<16x32xf32>
    %c0_1 = arith.constant 0 : index
    %c0_2 = arith.constant 0 : index
    %1 = vector.load %arg2[%c0_1, %c0_2] : memref<16x16xf32, #tpu.memory_space<vmem>>, vector<16x16xf32>
    %cst = arith.constant 1.000000e+00 : f32
    %2 = vector.broadcast %cst : f32 to vector<16x1xf32>
    %cst_3 = arith.constant dense<0.000000e+00> : vector<16x1xf32>
    %3 = tpu.matmul %1, %2, %cst_3 {dimension_numbers = #tpu.dot_dimension_numbers<[0], [0], [1], [1], [0, 1, 1, 1], [], []>} : vector<16x16xf32>, vector<16x1xf32>, vector<16x1xf32> -> vector<16x1xf32>
    %cst_4 = arith.constant 9.99999996E-13 : f32
    %4 = vector.broadcast %cst_4 : f32 to vector<16x1xf32>
    %5 = arith.maximumf %3, %4 : vector<16x1xf32>
    %6 = math.rsqrt %5 : vector<16x1xf32>
    %c0_5 = arith.constant 0 : index
    %c0_6 = arith.constant 0 : index
    %7 = vector.load %arg3[%c0_5, %c0_6] : memref<32x32xf32, #tpu.memory_space<vmem>>, vector<32x32xf32>
    %cst_7 = arith.constant dense<0.000000e+00> : vector<16x32xf32>
    %8 = tpu.matmul %0, %7, %cst_7 {dimension_numbers = #tpu.dot_dimension_numbers<[1], [0], [0], [1], [0, 0, 1, 1], [], []>} : vector<16x32xf32>, vector<32x32xf32>, vector<16x32xf32> -> vector<16x32xf32>
    %9 = vector.broadcast %6 : vector<16x1xf32> to vector<16x32xf32>
    %10 = arith.mulf %8, %9 : vector<16x32xf32>
    %cst_8 = arith.constant dense<0.000000e+00> : vector<16x32xf32>
    %11 = tpu.matmul %1, %10, %cst_8 {dimension_numbers = #tpu.dot_dimension_numbers<[0], [0], [1], [1], [0, 1, 1, 1], [], []>} : vector<16x16xf32>, vector<16x32xf32>, vector<16x32xf32> -> vector<16x32xf32>
    %12 = vector.broadcast %6 : vector<16x1xf32> to vector<16x32xf32>
    %13 = arith.mulf %11, %12 : vector<16x32xf32>
    %c0_9 = arith.constant 0 : index
    %c0_10 = arith.constant 0 : index
    %14 = vector.load %arg4[%c0_9, %c0_10] : memref<1x32xf32, #tpu.memory_space<vmem>>, vector<1x32xf32>
    %15 = vector.broadcast %14 : vector<1x32xf32> to vector<16x32xf32>
    %16 = arith.addf %13, %15 : vector<16x32xf32>
    %cst_11 = arith.constant 1.000000e+00 : f32
    %17 = vector.broadcast %cst_11 : f32 to vector<16x16xf32>
    %18 = arith.subf %17, %1 : vector<16x16xf32>
    %cst_12 = arith.constant -1.000000e+30 : f32
    %19 = vector.broadcast %cst_12 : f32 to vector<16x16xf32>
    %20 = arith.mulf %19, %18 : vector<16x16xf32>
    %21 = tpu.transpose %16, [1, 0] : vector<16x32xf32> -> vector<32x16xf32>
    %c0_13 = arith.constant 0 : index
    %c0_14 = arith.constant 0 : index
    %22 = vector.load %arg5[%c0_13, %c0_14] : memref<32x1xf32, #tpu.memory_space<vmem>>, vector<32x1xf32>
    %cst_15 = arith.constant 0.000000e+00 : f32
    %23 = vector.broadcast %cst_15 : f32 to vector<16x1xf32>
    %24 = vector.extract_strided_slice %21 {offsets = [0, 0], sizes = [1, 16], strides = [1, 1]} : vector<32x16xf32> to vector<1x16xf32>
    %25 = vector.broadcast %24 : vector<1x16xf32> to vector<16x16xf32>
    %26 = arith.addf %25, %20 : vector<16x16xf32>
    %cst_16 = arith.constant dense<0xFF800000> : vector<16xf32>
    %27 = vector.multi_reduction <maximumf>, %26, %cst_16 [1] : vector<16x16xf32> to vector<16xf32>
    %28 = vector.shape_cast %27 : vector<16xf32> to vector<16x1xf32>
    %29 = vector.extract_strided_slice %22 {offsets = [0, 0], sizes = [1, 1], strides = [1, 1]} : vector<32x1xf32> to vector<1x1xf32>
    %30 = vector.broadcast %29 : vector<1x1xf32> to vector<16x1xf32>
    %31 = arith.mulf %28, %30 : vector<16x1xf32>
    %32 = arith.addf %23, %31 : vector<16x1xf32>
    %33 = vector.extract_strided_slice %21 {offsets = [1, 0], sizes = [1, 16], strides = [1, 1]} : vector<32x16xf32> to vector<1x16xf32>
    %34 = vector.broadcast %33 : vector<1x16xf32> to vector<16x16xf32>
    %35 = arith.addf %34, %20 : vector<16x16xf32>
    %cst_17 = arith.constant dense<0xFF800000> : vector<16xf32>
    %36 = vector.multi_reduction <maximumf>, %35, %cst_17 [1] : vector<16x16xf32> to vector<16xf32>
    %37 = vector.shape_cast %36 : vector<16xf32> to vector<16x1xf32>
    %38 = vector.extract_strided_slice %22 {offsets = [1, 0], sizes = [1, 1], strides = [1, 1]} : vector<32x1xf32> to vector<1x1xf32>
    %39 = vector.broadcast %38 : vector<1x1xf32> to vector<16x1xf32>
    %40 = arith.mulf %37, %39 : vector<16x1xf32>
    %41 = arith.addf %32, %40 : vector<16x1xf32>
    %42 = vector.extract_strided_slice %21 {offsets = [2, 0], sizes = [1, 16], strides = [1, 1]} : vector<32x16xf32> to vector<1x16xf32>
    %43 = vector.broadcast %42 : vector<1x16xf32> to vector<16x16xf32>
    %44 = arith.addf %43, %20 : vector<16x16xf32>
    %cst_18 = arith.constant dense<0xFF800000> : vector<16xf32>
    %45 = vector.multi_reduction <maximumf>, %44, %cst_18 [1] : vector<16x16xf32> to vector<16xf32>
    %46 = vector.shape_cast %45 : vector<16xf32> to vector<16x1xf32>
    %47 = vector.extract_strided_slice %22 {offsets = [2, 0], sizes = [1, 1], strides = [1, 1]} : vector<32x1xf32> to vector<1x1xf32>
    %48 = vector.broadcast %47 : vector<1x1xf32> to vector<16x1xf32>
    %49 = arith.mulf %46, %48 : vector<16x1xf32>
    %50 = arith.addf %41, %49 : vector<16x1xf32>
    %51 = vector.extract_strided_slice %21 {offsets = [3, 0], sizes = [1, 16], strides = [1, 1]} : vector<32x16xf32> to vector<1x16xf32>
    %52 = vector.broadcast %51 : vector<1x16xf32> to vector<16x16xf32>
    %53 = arith.addf %52, %20 : vector<16x16xf32>
    %cst_19 = arith.constant dense<0xFF800000> : vector<16xf32>
    %54 = vector.multi_reduction <maximumf>, %53, %cst_19 [1] : vector<16x16xf32> to vector<16xf32>
    %55 = vector.shape_cast %54 : vector<16xf32> to vector<16x1xf32>
    %56 = vector.extract_strided_slice %22 {offsets = [3, 0], sizes = [1, 1], strides = [1, 1]} : vector<32x1xf32> to vector<1x1xf32>
    %57 = vector.broadcast %56 : vector<1x1xf32> to vector<16x1xf32>
    %58 = arith.mulf %55, %57 : vector<16x1xf32>
    %59 = arith.addf %50, %58 : vector<16x1xf32>
    %60 = vector.extract_strided_slice %21 {offsets = [4, 0], sizes = [1, 16], strides = [1, 1]} : vector<32x16xf32> to vector<1x16xf32>
    %61 = vector.broadcast %60 : vector<1x16xf32> to vector<16x16xf32>
    %62 = arith.addf %61, %20 : vector<16x16xf32>
    %cst_20 = arith.constant dense<0xFF800000> : vector<16xf32>
    %63 = vector.multi_reduction <maximumf>, %62, %cst_20 [1] : vector<16x16xf32> to vector<16xf32>
    %64 = vector.shape_cast %63 : vector<16xf32> to vector<16x1xf32>
    %65 = vector.extract_strided_slice %22 {offsets = [4, 0], sizes = [1, 1], strides = [1, 1]} : vector<32x1xf32> to vector<1x1xf32>
    %66 = vector.broadcast %65 : vector<1x1xf32> to vector<16x1xf32>
    %67 = arith.mulf %64, %66 : vector<16x1xf32>
    %68 = arith.addf %59, %67 : vector<16x1xf32>
    %69 = vector.extract_strided_slice %21 {offsets = [5, 0], sizes = [1, 16], strides = [1, 1]} : vector<32x16xf32> to vector<1x16xf32>
    %70 = vector.broadcast %69 : vector<1x16xf32> to vector<16x16xf32>
    %71 = arith.addf %70, %20 : vector<16x16xf32>
    %cst_21 = arith.constant dense<0xFF800000> : vector<16xf32>
    %72 = vector.multi_reduction <maximumf>, %71, %cst_21 [1] : vector<16x16xf32> to vector<16xf32>
    %73 = vector.shape_cast %72 : vector<16xf32> to vector<16x1xf32>
    %74 = vector.extract_strided_slice %22 {offsets = [5, 0], sizes = [1, 1], strides = [1, 1]} : vector<32x1xf32> to vector<1x1xf32>
    %75 = vector.broadcast %74 : vector<1x1xf32> to vector<16x1xf32>
    %76 = arith.mulf %73, %75 : vector<16x1xf32>
    %77 = arith.addf %68, %76 : vector<16x1xf32>
    %78 = vector.extract_strided_slice %21 {offsets = [6, 0], sizes = [1, 16], strides = [1, 1]} : vector<32x16xf32> to vector<1x16xf32>
    %79 = vector.broadcast %78 : vector<1x16xf32> to vector<16x16xf32>
    %80 = arith.addf %79, %20 : vector<16x16xf32>
    %cst_22 = arith.constant dense<0xFF800000> : vector<16xf32>
    %81 = vector.multi_reduction <maximumf>, %80, %cst_22 [1] : vector<16x16xf32> to vector<16xf32>
    %82 = vector.shape_cast %81 : vector<16xf32> to vector<16x1xf32>
    %83 = vector.extract_strided_slice %22 {offsets = [6, 0], sizes = [1, 1], strides = [1, 1]} : vector<32x1xf32> to vector<1x1xf32>
    %84 = vector.broadcast %83 : vector<1x1xf32> to vector<16x1xf32>
    %85 = arith.mulf %82, %84 : vector<16x1xf32>
    %86 = arith.addf %77, %85 : vector<16x1xf32>
    %87 = vector.extract_strided_slice %21 {offsets = [7, 0], sizes = [1, 16], strides = [1, 1]} : vector<32x16xf32> to vector<1x16xf32>
    %88 = vector.broadcast %87 : vector<1x16xf32> to vector<16x16xf32>
    %89 = arith.addf %88, %20 : vector<16x16xf32>
    %cst_23 = arith.constant dense<0xFF800000> : vector<16xf32>
    %90 = vector.multi_reduction <maximumf>, %89, %cst_23 [1] : vector<16x16xf32> to vector<16xf32>
    %91 = vector.shape_cast %90 : vector<16xf32> to vector<16x1xf32>
    %92 = vector.extract_strided_slice %22 {offsets = [7, 0], sizes = [1, 1], strides = [1, 1]} : vector<32x1xf32> to vector<1x1xf32>
    %93 = vector.broadcast %92 : vector<1x1xf32> to vector<16x1xf32>
    %94 = arith.mulf %91, %93 : vector<16x1xf32>
    %95 = arith.addf %86, %94 : vector<16x1xf32>
    %96 = vector.extract_strided_slice %21 {offsets = [8, 0], sizes = [1, 16], strides = [1, 1]} : vector<32x16xf32> to vector<1x16xf32>
    %97 = vector.broadcast %96 : vector<1x16xf32> to vector<16x16xf32>
    %98 = arith.addf %97, %20 : vector<16x16xf32>
    %cst_24 = arith.constant dense<0xFF800000> : vector<16xf32>
    %99 = vector.multi_reduction <maximumf>, %98, %cst_24 [1] : vector<16x16xf32> to vector<16xf32>
    %100 = vector.shape_cast %99 : vector<16xf32> to vector<16x1xf32>
    %101 = vector.extract_strided_slice %22 {offsets = [8, 0], sizes = [1, 1], strides = [1, 1]} : vector<32x1xf32> to vector<1x1xf32>
    %102 = vector.broadcast %101 : vector<1x1xf32> to vector<16x1xf32>
    %103 = arith.mulf %100, %102 : vector<16x1xf32>
    %104 = arith.addf %95, %103 : vector<16x1xf32>
    %105 = vector.extract_strided_slice %21 {offsets = [9, 0], sizes = [1, 16], strides = [1, 1]} : vector<32x16xf32> to vector<1x16xf32>
    %106 = vector.broadcast %105 : vector<1x16xf32> to vector<16x16xf32>
    %107 = arith.addf %106, %20 : vector<16x16xf32>
    %cst_25 = arith.constant dense<0xFF800000> : vector<16xf32>
    %108 = vector.multi_reduction <maximumf>, %107, %cst_25 [1] : vector<16x16xf32> to vector<16xf32>
    %109 = vector.shape_cast %108 : vector<16xf32> to vector<16x1xf32>
    %110 = vector.extract_strided_slice %22 {offsets = [9, 0], sizes = [1, 1], strides = [1, 1]} : vector<32x1xf32> to vector<1x1xf32>
    %111 = vector.broadcast %110 : vector<1x1xf32> to vector<16x1xf32>
    %112 = arith.mulf %109, %111 : vector<16x1xf32>
    %113 = arith.addf %104, %112 : vector<16x1xf32>
    %114 = vector.extract_strided_slice %21 {offsets = [10, 0], sizes = [1, 16], strides = [1, 1]} : vector<32x16xf32> to vector<1x16xf32>
    %115 = vector.broadcast %114 : vector<1x16xf32> to vector<16x16xf32>
    %116 = arith.addf %115, %20 : vector<16x16xf32>
    %cst_26 = arith.constant dense<0xFF800000> : vector<16xf32>
    %117 = vector.multi_reduction <maximumf>, %116, %cst_26 [1] : vector<16x16xf32> to vector<16xf32>
    %118 = vector.shape_cast %117 : vector<16xf32> to vector<16x1xf32>
    %119 = vector.extract_strided_slice %22 {offsets = [10, 0], sizes = [1, 1], strides = [1, 1]} : vector<32x1xf32> to vector<1x1xf32>
    %120 = vector.broadcast %119 : vector<1x1xf32> to vector<16x1xf32>
    %121 = arith.mulf %118, %120 : vector<16x1xf32>
    %122 = arith.addf %113, %121 : vector<16x1xf32>
    %123 = vector.extract_strided_slice %21 {offsets = [11, 0], sizes = [1, 16], strides = [1, 1]} : vector<32x16xf32> to vector<1x16xf32>
    %124 = vector.broadcast %123 : vector<1x16xf32> to vector<16x16xf32>
    %125 = arith.addf %124, %20 : vector<16x16xf32>
    %cst_27 = arith.constant dense<0xFF800000> : vector<16xf32>
    %126 = vector.multi_reduction <maximumf>, %125, %cst_27 [1] : vector<16x16xf32> to vector<16xf32>
    %127 = vector.shape_cast %126 : vector<16xf32> to vector<16x1xf32>
    %128 = vector.extract_strided_slice %22 {offsets = [11, 0], sizes = [1, 1], strides = [1, 1]} : vector<32x1xf32> to vector<1x1xf32>
    %129 = vector.broadcast %128 : vector<1x1xf32> to vector<16x1xf32>
    %130 = arith.mulf %127, %129 : vector<16x1xf32>
    %131 = arith.addf %122, %130 : vector<16x1xf32>
    %132 = vector.extract_strided_slice %21 {offsets = [12, 0], sizes = [1, 16], strides = [1, 1]} : vector<32x16xf32> to vector<1x16xf32>
    %133 = vector.broadcast %132 : vector<1x16xf32> to vector<16x16xf32>
    %134 = arith.addf %133, %20 : vector<16x16xf32>
    %cst_28 = arith.constant dense<0xFF800000> : vector<16xf32>
    %135 = vector.multi_reduction <maximumf>, %134, %cst_28 [1] : vector<16x16xf32> to vector<16xf32>
    %136 = vector.shape_cast %135 : vector<16xf32> to vector<16x1xf32>
    %137 = vector.extract_strided_slice %22 {offsets = [12, 0], sizes = [1, 1], strides = [1, 1]} : vector<32x1xf32> to vector<1x1xf32>
    %138 = vector.broadcast %137 : vector<1x1xf32> to vector<16x1xf32>
    %139 = arith.mulf %136, %138 : vector<16x1xf32>
    %140 = arith.addf %131, %139 : vector<16x1xf32>
    %141 = vector.extract_strided_slice %21 {offsets = [13, 0], sizes = [1, 16], strides = [1, 1]} : vector<32x16xf32> to vector<1x16xf32>
    %142 = vector.broadcast %141 : vector<1x16xf32> to vector<16x16xf32>
    %143 = arith.addf %142, %20 : vector<16x16xf32>
    %cst_29 = arith.constant dense<0xFF800000> : vector<16xf32>
    %144 = vector.multi_reduction <maximumf>, %143, %cst_29 [1] : vector<16x16xf32> to vector<16xf32>
    %145 = vector.shape_cast %144 : vector<16xf32> to vector<16x1xf32>
    %146 = vector.extract_strided_slice %22 {offsets = [13, 0], sizes = [1, 1], strides = [1, 1]} : vector<32x1xf32> to vector<1x1xf32>
    %147 = vector.broadcast %146 : vector<1x1xf32> to vector<16x1xf32>
    %148 = arith.mulf %145, %147 : vector<16x1xf32>
    %149 = arith.addf %140, %148 : vector<16x1xf32>
    %150 = vector.extract_strided_slice %21 {offsets = [14, 0], sizes = [1, 16], strides = [1, 1]} : vector<32x16xf32> to vector<1x16xf32>
    %151 = vector.broadcast %150 : vector<1x16xf32> to vector<16x16xf32>
    %152 = arith.addf %151, %20 : vector<16x16xf32>
    %cst_30 = arith.constant dense<0xFF800000> : vector<16xf32>
    %153 = vector.multi_reduction <maximumf>, %152, %cst_30 [1] : vector<16x16xf32> to vector<16xf32>
    %154 = vector.shape_cast %153 : vector<16xf32> to vector<16x1xf32>
    %155 = vector.extract_strided_slice %22 {offsets = [14, 0], sizes = [1, 1], strides = [1, 1]} : vector<32x1xf32> to vector<1x1xf32>
    %156 = vector.broadcast %155 : vector<1x1xf32> to vector<16x1xf32>
    %157 = arith.mulf %154, %156 : vector<16x1xf32>
    %158 = arith.addf %149, %157 : vector<16x1xf32>
    %159 = vector.extract_strided_slice %21 {offsets = [15, 0], sizes = [1, 16], strides = [1, 1]} : vector<32x16xf32> to vector<1x16xf32>
    %160 = vector.broadcast %159 : vector<1x16xf32> to vector<16x16xf32>
    %161 = arith.addf %160, %20 : vector<16x16xf32>
    %cst_31 = arith.constant dense<0xFF800000> : vector<16xf32>
    %162 = vector.multi_reduction <maximumf>, %161, %cst_31 [1] : vector<16x16xf32> to vector<16xf32>
    %163 = vector.shape_cast %162 : vector<16xf32> to vector<16x1xf32>
    %164 = vector.extract_strided_slice %22 {offsets = [15, 0], sizes = [1, 1], strides = [1, 1]} : vector<32x1xf32> to vector<1x1xf32>
    %165 = vector.broadcast %164 : vector<1x1xf32> to vector<16x1xf32>
    %166 = arith.mulf %163, %165 : vector<16x1xf32>
    %167 = arith.addf %158, %166 : vector<16x1xf32>
    %168 = vector.extract_strided_slice %21 {offsets = [16, 0], sizes = [1, 16], strides = [1, 1]} : vector<32x16xf32> to vector<1x16xf32>
    %169 = vector.broadcast %168 : vector<1x16xf32> to vector<16x16xf32>
    %170 = arith.addf %169, %20 : vector<16x16xf32>
    %cst_32 = arith.constant dense<0xFF800000> : vector<16xf32>
    %171 = vector.multi_reduction <maximumf>, %170, %cst_32 [1] : vector<16x16xf32> to vector<16xf32>
    %172 = vector.shape_cast %171 : vector<16xf32> to vector<16x1xf32>
    %173 = vector.extract_strided_slice %22 {offsets = [16, 0], sizes = [1, 1], strides = [1, 1]} : vector<32x1xf32> to vector<1x1xf32>
    %174 = vector.broadcast %173 : vector<1x1xf32> to vector<16x1xf32>
    %175 = arith.mulf %172, %174 : vector<16x1xf32>
    %176 = arith.addf %167, %175 : vector<16x1xf32>
    %177 = vector.extract_strided_slice %21 {offsets = [17, 0], sizes = [1, 16], strides = [1, 1]} : vector<32x16xf32> to vector<1x16xf32>
    %178 = vector.broadcast %177 : vector<1x16xf32> to vector<16x16xf32>
    %179 = arith.addf %178, %20 : vector<16x16xf32>
    %cst_33 = arith.constant dense<0xFF800000> : vector<16xf32>
    %180 = vector.multi_reduction <maximumf>, %179, %cst_33 [1] : vector<16x16xf32> to vector<16xf32>
    %181 = vector.shape_cast %180 : vector<16xf32> to vector<16x1xf32>
    %182 = vector.extract_strided_slice %22 {offsets = [17, 0], sizes = [1, 1], strides = [1, 1]} : vector<32x1xf32> to vector<1x1xf32>
    %183 = vector.broadcast %182 : vector<1x1xf32> to vector<16x1xf32>
    %184 = arith.mulf %181, %183 : vector<16x1xf32>
    %185 = arith.addf %176, %184 : vector<16x1xf32>
    %186 = vector.extract_strided_slice %21 {offsets = [18, 0], sizes = [1, 16], strides = [1, 1]} : vector<32x16xf32> to vector<1x16xf32>
    %187 = vector.broadcast %186 : vector<1x16xf32> to vector<16x16xf32>
    %188 = arith.addf %187, %20 : vector<16x16xf32>
    %cst_34 = arith.constant dense<0xFF800000> : vector<16xf32>
    %189 = vector.multi_reduction <maximumf>, %188, %cst_34 [1] : vector<16x16xf32> to vector<16xf32>
    %190 = vector.shape_cast %189 : vector<16xf32> to vector<16x1xf32>
    %191 = vector.extract_strided_slice %22 {offsets = [18, 0], sizes = [1, 1], strides = [1, 1]} : vector<32x1xf32> to vector<1x1xf32>
    %192 = vector.broadcast %191 : vector<1x1xf32> to vector<16x1xf32>
    %193 = arith.mulf %190, %192 : vector<16x1xf32>
    %194 = arith.addf %185, %193 : vector<16x1xf32>
    %195 = vector.extract_strided_slice %21 {offsets = [19, 0], sizes = [1, 16], strides = [1, 1]} : vector<32x16xf32> to vector<1x16xf32>
    %196 = vector.broadcast %195 : vector<1x16xf32> to vector<16x16xf32>
    %197 = arith.addf %196, %20 : vector<16x16xf32>
    %cst_35 = arith.constant dense<0xFF800000> : vector<16xf32>
    %198 = vector.multi_reduction <maximumf>, %197, %cst_35 [1] : vector<16x16xf32> to vector<16xf32>
    %199 = vector.shape_cast %198 : vector<16xf32> to vector<16x1xf32>
    %200 = vector.extract_strided_slice %22 {offsets = [19, 0], sizes = [1, 1], strides = [1, 1]} : vector<32x1xf32> to vector<1x1xf32>
    %201 = vector.broadcast %200 : vector<1x1xf32> to vector<16x1xf32>
    %202 = arith.mulf %199, %201 : vector<16x1xf32>
    %203 = arith.addf %194, %202 : vector<16x1xf32>
    %204 = vector.extract_strided_slice %21 {offsets = [20, 0], sizes = [1, 16], strides = [1, 1]} : vector<32x16xf32> to vector<1x16xf32>
    %205 = vector.broadcast %204 : vector<1x16xf32> to vector<16x16xf32>
    %206 = arith.addf %205, %20 : vector<16x16xf32>
    %cst_36 = arith.constant dense<0xFF800000> : vector<16xf32>
    %207 = vector.multi_reduction <maximumf>, %206, %cst_36 [1] : vector<16x16xf32> to vector<16xf32>
    %208 = vector.shape_cast %207 : vector<16xf32> to vector<16x1xf32>
    %209 = vector.extract_strided_slice %22 {offsets = [20, 0], sizes = [1, 1], strides = [1, 1]} : vector<32x1xf32> to vector<1x1xf32>
    %210 = vector.broadcast %209 : vector<1x1xf32> to vector<16x1xf32>
    %211 = arith.mulf %208, %210 : vector<16x1xf32>
    %212 = arith.addf %203, %211 : vector<16x1xf32>
    %213 = vector.extract_strided_slice %21 {offsets = [21, 0], sizes = [1, 16], strides = [1, 1]} : vector<32x16xf32> to vector<1x16xf32>
    %214 = vector.broadcast %213 : vector<1x16xf32> to vector<16x16xf32>
    %215 = arith.addf %214, %20 : vector<16x16xf32>
    %cst_37 = arith.constant dense<0xFF800000> : vector<16xf32>
    %216 = vector.multi_reduction <maximumf>, %215, %cst_37 [1] : vector<16x16xf32> to vector<16xf32>
    %217 = vector.shape_cast %216 : vector<16xf32> to vector<16x1xf32>
    %218 = vector.extract_strided_slice %22 {offsets = [21, 0], sizes = [1, 1], strides = [1, 1]} : vector<32x1xf32> to vector<1x1xf32>
    %219 = vector.broadcast %218 : vector<1x1xf32> to vector<16x1xf32>
    %220 = arith.mulf %217, %219 : vector<16x1xf32>
    %221 = arith.addf %212, %220 : vector<16x1xf32>
    %222 = vector.extract_strided_slice %21 {offsets = [22, 0], sizes = [1, 16], strides = [1, 1]} : vector<32x16xf32> to vector<1x16xf32>
    %223 = vector.broadcast %222 : vector<1x16xf32> to vector<16x16xf32>
    %224 = arith.addf %223, %20 : vector<16x16xf32>
    %cst_38 = arith.constant dense<0xFF800000> : vector<16xf32>
    %225 = vector.multi_reduction <maximumf>, %224, %cst_38 [1] : vector<16x16xf32> to vector<16xf32>
    %226 = vector.shape_cast %225 : vector<16xf32> to vector<16x1xf32>
    %227 = vector.extract_strided_slice %22 {offsets = [22, 0], sizes = [1, 1], strides = [1, 1]} : vector<32x1xf32> to vector<1x1xf32>
    %228 = vector.broadcast %227 : vector<1x1xf32> to vector<16x1xf32>
    %229 = arith.mulf %226, %228 : vector<16x1xf32>
    %230 = arith.addf %221, %229 : vector<16x1xf32>
    %231 = vector.extract_strided_slice %21 {offsets = [23, 0], sizes = [1, 16], strides = [1, 1]} : vector<32x16xf32> to vector<1x16xf32>
    %232 = vector.broadcast %231 : vector<1x16xf32> to vector<16x16xf32>
    %233 = arith.addf %232, %20 : vector<16x16xf32>
    %cst_39 = arith.constant dense<0xFF800000> : vector<16xf32>
    %234 = vector.multi_reduction <maximumf>, %233, %cst_39 [1] : vector<16x16xf32> to vector<16xf32>
    %235 = vector.shape_cast %234 : vector<16xf32> to vector<16x1xf32>
    %236 = vector.extract_strided_slice %22 {offsets = [23, 0], sizes = [1, 1], strides = [1, 1]} : vector<32x1xf32> to vector<1x1xf32>
    %237 = vector.broadcast %236 : vector<1x1xf32> to vector<16x1xf32>
    %238 = arith.mulf %235, %237 : vector<16x1xf32>
    %239 = arith.addf %230, %238 : vector<16x1xf32>
    %240 = vector.extract_strided_slice %21 {offsets = [24, 0], sizes = [1, 16], strides = [1, 1]} : vector<32x16xf32> to vector<1x16xf32>
    %241 = vector.broadcast %240 : vector<1x16xf32> to vector<16x16xf32>
    %242 = arith.addf %241, %20 : vector<16x16xf32>
    %cst_40 = arith.constant dense<0xFF800000> : vector<16xf32>
    %243 = vector.multi_reduction <maximumf>, %242, %cst_40 [1] : vector<16x16xf32> to vector<16xf32>
    %244 = vector.shape_cast %243 : vector<16xf32> to vector<16x1xf32>
    %245 = vector.extract_strided_slice %22 {offsets = [24, 0], sizes = [1, 1], strides = [1, 1]} : vector<32x1xf32> to vector<1x1xf32>
    %246 = vector.broadcast %245 : vector<1x1xf32> to vector<16x1xf32>
    %247 = arith.mulf %244, %246 : vector<16x1xf32>
    %248 = arith.addf %239, %247 : vector<16x1xf32>
    %249 = vector.extract_strided_slice %21 {offsets = [25, 0], sizes = [1, 16], strides = [1, 1]} : vector<32x16xf32> to vector<1x16xf32>
    %250 = vector.broadcast %249 : vector<1x16xf32> to vector<16x16xf32>
    %251 = arith.addf %250, %20 : vector<16x16xf32>
    %cst_41 = arith.constant dense<0xFF800000> : vector<16xf32>
    %252 = vector.multi_reduction <maximumf>, %251, %cst_41 [1] : vector<16x16xf32> to vector<16xf32>
    %253 = vector.shape_cast %252 : vector<16xf32> to vector<16x1xf32>
    %254 = vector.extract_strided_slice %22 {offsets = [25, 0], sizes = [1, 1], strides = [1, 1]} : vector<32x1xf32> to vector<1x1xf32>
    %255 = vector.broadcast %254 : vector<1x1xf32> to vector<16x1xf32>
    %256 = arith.mulf %253, %255 : vector<16x1xf32>
    %257 = arith.addf %248, %256 : vector<16x1xf32>
    %258 = vector.extract_strided_slice %21 {offsets = [26, 0], sizes = [1, 16], strides = [1, 1]} : vector<32x16xf32> to vector<1x16xf32>
    %259 = vector.broadcast %258 : vector<1x16xf32> to vector<16x16xf32>
    %260 = arith.addf %259, %20 : vector<16x16xf32>
    %cst_42 = arith.constant dense<0xFF800000> : vector<16xf32>
    %261 = vector.multi_reduction <maximumf>, %260, %cst_42 [1] : vector<16x16xf32> to vector<16xf32>
    %262 = vector.shape_cast %261 : vector<16xf32> to vector<16x1xf32>
    %263 = vector.extract_strided_slice %22 {offsets = [26, 0], sizes = [1, 1], strides = [1, 1]} : vector<32x1xf32> to vector<1x1xf32>
    %264 = vector.broadcast %263 : vector<1x1xf32> to vector<16x1xf32>
    %265 = arith.mulf %262, %264 : vector<16x1xf32>
    %266 = arith.addf %257, %265 : vector<16x1xf32>
    %267 = vector.extract_strided_slice %21 {offsets = [27, 0], sizes = [1, 16], strides = [1, 1]} : vector<32x16xf32> to vector<1x16xf32>
    %268 = vector.broadcast %267 : vector<1x16xf32> to vector<16x16xf32>
    %269 = arith.addf %268, %20 : vector<16x16xf32>
    %cst_43 = arith.constant dense<0xFF800000> : vector<16xf32>
    %270 = vector.multi_reduction <maximumf>, %269, %cst_43 [1] : vector<16x16xf32> to vector<16xf32>
    %271 = vector.shape_cast %270 : vector<16xf32> to vector<16x1xf32>
    %272 = vector.extract_strided_slice %22 {offsets = [27, 0], sizes = [1, 1], strides = [1, 1]} : vector<32x1xf32> to vector<1x1xf32>
    %273 = vector.broadcast %272 : vector<1x1xf32> to vector<16x1xf32>
    %274 = arith.mulf %271, %273 : vector<16x1xf32>
    %275 = arith.addf %266, %274 : vector<16x1xf32>
    %276 = vector.extract_strided_slice %21 {offsets = [28, 0], sizes = [1, 16], strides = [1, 1]} : vector<32x16xf32> to vector<1x16xf32>
    %277 = vector.broadcast %276 : vector<1x16xf32> to vector<16x16xf32>
    %278 = arith.addf %277, %20 : vector<16x16xf32>
    %cst_44 = arith.constant dense<0xFF800000> : vector<16xf32>
    %279 = vector.multi_reduction <maximumf>, %278, %cst_44 [1] : vector<16x16xf32> to vector<16xf32>
    %280 = vector.shape_cast %279 : vector<16xf32> to vector<16x1xf32>
    %281 = vector.extract_strided_slice %22 {offsets = [28, 0], sizes = [1, 1], strides = [1, 1]} : vector<32x1xf32> to vector<1x1xf32>
    %282 = vector.broadcast %281 : vector<1x1xf32> to vector<16x1xf32>
    %283 = arith.mulf %280, %282 : vector<16x1xf32>
    %284 = arith.addf %275, %283 : vector<16x1xf32>
    %285 = vector.extract_strided_slice %21 {offsets = [29, 0], sizes = [1, 16], strides = [1, 1]} : vector<32x16xf32> to vector<1x16xf32>
    %286 = vector.broadcast %285 : vector<1x16xf32> to vector<16x16xf32>
    %287 = arith.addf %286, %20 : vector<16x16xf32>
    %cst_45 = arith.constant dense<0xFF800000> : vector<16xf32>
    %288 = vector.multi_reduction <maximumf>, %287, %cst_45 [1] : vector<16x16xf32> to vector<16xf32>
    %289 = vector.shape_cast %288 : vector<16xf32> to vector<16x1xf32>
    %290 = vector.extract_strided_slice %22 {offsets = [29, 0], sizes = [1, 1], strides = [1, 1]} : vector<32x1xf32> to vector<1x1xf32>
    %291 = vector.broadcast %290 : vector<1x1xf32> to vector<16x1xf32>
    %292 = arith.mulf %289, %291 : vector<16x1xf32>
    %293 = arith.addf %284, %292 : vector<16x1xf32>
    %294 = vector.extract_strided_slice %21 {offsets = [30, 0], sizes = [1, 16], strides = [1, 1]} : vector<32x16xf32> to vector<1x16xf32>
    %295 = vector.broadcast %294 : vector<1x16xf32> to vector<16x16xf32>
    %296 = arith.addf %295, %20 : vector<16x16xf32>
    %cst_46 = arith.constant dense<0xFF800000> : vector<16xf32>
    %297 = vector.multi_reduction <maximumf>, %296, %cst_46 [1] : vector<16x16xf32> to vector<16xf32>
    %298 = vector.shape_cast %297 : vector<16xf32> to vector<16x1xf32>
    %299 = vector.extract_strided_slice %22 {offsets = [30, 0], sizes = [1, 1], strides = [1, 1]} : vector<32x1xf32> to vector<1x1xf32>
    %300 = vector.broadcast %299 : vector<1x1xf32> to vector<16x1xf32>
    %301 = arith.mulf %298, %300 : vector<16x1xf32>
    %302 = arith.addf %293, %301 : vector<16x1xf32>
    %303 = vector.extract_strided_slice %21 {offsets = [31, 0], sizes = [1, 16], strides = [1, 1]} : vector<32x16xf32> to vector<1x16xf32>
    %304 = vector.broadcast %303 : vector<1x16xf32> to vector<16x16xf32>
    %305 = arith.addf %304, %20 : vector<16x16xf32>
    %cst_47 = arith.constant dense<0xFF800000> : vector<16xf32>
    %306 = vector.multi_reduction <maximumf>, %305, %cst_47 [1] : vector<16x16xf32> to vector<16xf32>
    %307 = vector.shape_cast %306 : vector<16xf32> to vector<16x1xf32>
    %308 = vector.extract_strided_slice %22 {offsets = [31, 0], sizes = [1, 1], strides = [1, 1]} : vector<32x1xf32> to vector<1x1xf32>
    %309 = vector.broadcast %308 : vector<1x1xf32> to vector<16x1xf32>
    %310 = arith.mulf %307, %309 : vector<16x1xf32>
    %311 = arith.addf %302, %310 : vector<16x1xf32>
    %c0_48 = arith.constant 0 : index
    %c0_49 = arith.constant 0 : index
    %312 = vector.load %arg6[%c0_48, %c0_49] : memref<1x1xf32, #tpu.memory_space<vmem>>, vector<1x1xf32>
    %313 = vector.broadcast %312 : vector<1x1xf32> to vector<16x1xf32>
    %314 = arith.addf %311, %313 : vector<16x1xf32>
    %c0_50 = arith.constant 0 : index
    %c0_51 = arith.constant 0 : index
    %315 = vector.load %arg7[%c0_50, %c0_51] : memref<1x32xf32, #tpu.memory_space<vmem>>, vector<1x32xf32>
    %cst_52 = arith.constant dense<0.000000e+00> : vector<1x16xf32>
    %316 = tpu.matmul %315, %21, %cst_52 {dimension_numbers = #tpu.dot_dimension_numbers<[1], [0], [0], [1], [0, 0, 1, 1], [], []>} : vector<1x32xf32>, vector<32x16xf32>, vector<1x16xf32> -> vector<1x16xf32>
    %317 = vector.broadcast %314 : vector<16x1xf32> to vector<16x16xf32>
    %318 = vector.broadcast %316 : vector<1x16xf32> to vector<16x16xf32>
    %319 = arith.addf %317, %318 : vector<16x16xf32>
    %c0_53 = arith.constant 0 : index
    %c0_54 = arith.constant 0 : index
    %320 = vector.load %arg8[%c0_53, %c0_54] : memref<1x1xf32, #tpu.memory_space<vmem>>, vector<1x1xf32>
    %321 = vector.broadcast %320 : vector<1x1xf32> to vector<16x16xf32>
    %322 = arith.addf %319, %321 : vector<16x16xf32>
    %cst_55 = arith.constant 0.000000e+00 : f32
    %323 = vector.broadcast %cst_55 : f32 to vector<16x16xf32>
    %324 = arith.cmpf ogt, %322, %323 : vector<16x16xf32>
    %cst_56 = arith.constant 2.000000e-01 : f32
    %325 = vector.broadcast %cst_56 : f32 to vector<16x16xf32>
    %326 = arith.mulf %325, %322 : vector<16x16xf32>
    %327 = arith.select %324, %322, %326 : vector<16x16xi1>, vector<16x16xf32>
    %328 = arith.addf %327, %20 : vector<16x16xf32>
    %cst_57 = arith.constant dense<0xFF800000> : vector<16xf32>
    %329 = vector.multi_reduction <maximumf>, %328, %cst_57 [1] : vector<16x16xf32> to vector<16xf32>
    %330 = vector.shape_cast %329 : vector<16xf32> to vector<16x1xf32>
    %331 = vector.broadcast %330 : vector<16x1xf32> to vector<16x16xf32>
    %332 = arith.subf %328, %331 : vector<16x16xf32>
    %333 = math.exp %332 : vector<16x16xf32>
    %cst_58 = arith.constant dense<0.000000e+00> : vector<16xf32>
    %334 = vector.multi_reduction <add>, %333, %cst_58 [1] : vector<16x16xf32> to vector<16xf32>
    %335 = vector.shape_cast %334 : vector<16xf32> to vector<16x1xf32>
    %336 = tpu.reciprocal %335 {approx = true} : vector<16x1xf32> -> vector<16x1xf32>
    %337 = vector.broadcast %336 : vector<16x1xf32> to vector<16x16xf32>
    %338 = arith.mulf %333, %337 : vector<16x16xf32>
    %cst_59 = arith.constant dense<0.000000e+00> : vector<16x32xf32>
    %339 = tpu.matmul %338, %0, %cst_59 {dimension_numbers = #tpu.dot_dimension_numbers<[1], [0], [0], [1], [0, 0, 1, 1], [], []>} : vector<16x16xf32>, vector<16x32xf32>, vector<16x32xf32> -> vector<16x32xf32>
    %c0_60 = arith.constant 0 : index
    %c0_61 = arith.constant 0 : index
    %340 = vector.load %arg9[%c0_60, %c0_61] : memref<32x3xf32, #tpu.memory_space<vmem>>, vector<32x3xf32>
    %cst_62 = arith.constant dense<0.000000e+00> : vector<16x3xf32>
    %341 = tpu.matmul %339, %340, %cst_62 {dimension_numbers = #tpu.dot_dimension_numbers<[1], [0], [0], [1], [0, 0, 1, 1], [], []>} : vector<16x32xf32>, vector<32x3xf32>, vector<16x3xf32> -> vector<16x3xf32>
    %c0_63 = arith.constant 0 : index
    %c0_64 = arith.constant 0 : index
    %342 = vector.load %arg10[%c0_63, %c0_64] : memref<1x3xf32, #tpu.memory_space<vmem>>, vector<1x3xf32>
    %343 = vector.broadcast %342 : vector<1x3xf32> to vector<16x3xf32>
    %344 = arith.addf %341, %343 : vector<16x3xf32>
    %345 = vector.extract_strided_slice %344 {offsets = [0, 0], sizes = [16, 1], strides = [1, 1]} : vector<16x3xf32> to vector<16x1xf32>
    %346 = vector.extract_strided_slice %344 {offsets = [0, 1], sizes = [16, 1], strides = [1, 1]} : vector<16x3xf32> to vector<16x1xf32>
    %347 = vector.extract_strided_slice %344 {offsets = [0, 2], sizes = [16, 1], strides = [1, 1]} : vector<16x3xf32> to vector<16x1xf32>
    %348 = arith.mulf %3, %345 : vector<16x1xf32>
    %cst_65 = arith.constant dense<0.000000e+00> : vector<16x1xf32>
    %349 = tpu.matmul %1, %346, %cst_65 {dimension_numbers = #tpu.dot_dimension_numbers<[0], [0], [1], [1], [0, 1, 1, 1], [], []>} : vector<16x16xf32>, vector<16x1xf32>, vector<16x1xf32> -> vector<16x1xf32>
    %350 = arith.subf %348, %349 : vector<16x1xf32>
    %351 = arith.addf %350, %347 : vector<16x1xf32>
    %cst_66 = arith.constant 0.000000e+00 : f32
    %352 = vector.broadcast %cst_66 : f32 to vector<16x1xf32>
    %353 = arith.subf %352, %351 : vector<16x1xf32>
    %354 = math.exp %353 : vector<16x1xf32>
    %cst_67 = arith.constant 1.000000e+00 : f32
    %355 = vector.broadcast %cst_67 : f32 to vector<16x1xf32>
    %356 = arith.addf %355, %354 : vector<16x1xf32>
    %357 = tpu.reciprocal %356 {approx = true} : vector<16x1xf32> -> vector<16x1xf32>
    %c0_68 = arith.constant 0 : index
    %c0_69 = arith.constant 0 : index
    %358 = vector.load %arg11[%c0_68, %c0_69] : memref<16x16xf32, #tpu.memory_space<vmem>>, vector<16x16xf32>
    tpu.vector_store %arg11[%c0_68, %c0_69], %338 {strides = array<i32>} : memref<16x16xf32, #tpu.memory_space<vmem>>, vector<16x16xf32>,
    %c0_70 = arith.constant 0 : index
    %c0_71 = arith.constant 0 : index
    %359 = vector.load %arg12[%c0_70, %c0_71] : memref<16x32xf32, #tpu.memory_space<vmem>>, vector<16x32xf32>
    tpu.vector_store %arg12[%c0_70, %c0_71], %339 {strides = array<i32>} : memref<16x32xf32, #tpu.memory_space<vmem>>, vector<16x32xf32>,
    %360 = tpu.transpose %357, [1, 0] : vector<16x1xf32> -> vector<1x16xf32>
    %c0_72 = arith.constant 0 : index
    %c0_73 = arith.constant 0 : index
    %361 = vector.load %arg13[%c0_72, %c0_73] : memref<1x16xf32, #tpu.memory_space<vmem>>, vector<1x16xf32>
    tpu.vector_store %arg13[%c0_72, %c0_73], %360 {strides = array<i32>} : memref<1x16xf32, #tpu.memory_space<vmem>>, vector<1x16xf32>,
    return
  }
  func.func @transform_0(%arg0: i32) -> (i32, i32) {
    %c0_i32 = arith.constant 0 : i32
    %c0_i32_0 = arith.constant 0 : i32
    %c0_i32_1 = arith.constant 0 : i32
    return %c0_i32, %c0_i32_0 : i32, i32
  }
  func.func @transform_1(%arg0: i32) -> (i32, i32) {
    %c0_i32 = arith.constant 0 : i32
    %c0_i32_0 = arith.constant 0 : i32
    %c0_i32_1 = arith.constant 0 : i32
    return %c0_i32, %c0_i32_0 : i32, i32
  }
  func.func @transform_2(%arg0: i32) -> (i32, i32) {
    %c0_i32 = arith.constant 0 : i32
    %c0_i32_0 = arith.constant 0 : i32
    %c0_i32_1 = arith.constant 0 : i32
    return %c0_i32, %c0_i32_0 : i32, i32
  }
  func.func @transform_3(%arg0: i32) -> (i32, i32) {
    %c0_i32 = arith.constant 0 : i32
    %c0_i32_0 = arith.constant 0 : i32
    %c0_i32_1 = arith.constant 0 : i32
    return %c0_i32, %c0_i32_0 : i32, i32
  }
  func.func @transform_4(%arg0: i32) -> (i32, i32) {
    %c0_i32 = arith.constant 0 : i32
    %c0_i32_0 = arith.constant 0 : i32
    %c0_i32_1 = arith.constant 0 : i32
    return %c0_i32, %c0_i32_0 : i32, i32
  }
  func.func @transform_5(%arg0: i32) -> (i32, i32) {
    %c0_i32 = arith.constant 0 : i32
    %c0_i32_0 = arith.constant 0 : i32
    %c0_i32_1 = arith.constant 0 : i32
    return %c0_i32, %c0_i32_0 : i32, i32
  }
  func.func @transform_6(%arg0: i32) -> (i32, i32) {
    %c0_i32 = arith.constant 0 : i32
    %c0_i32_0 = arith.constant 0 : i32
    %c0_i32_1 = arith.constant 0 : i32
    return %c0_i32, %c0_i32_0 : i32, i32
  }
  func.func @transform_7(%arg0: i32) -> (i32, i32) {
    %c0_i32 = arith.constant 0 : i32
    %c0_i32_0 = arith.constant 0 : i32
    %c0_i32_1 = arith.constant 0 : i32
    return %c0_i32, %c0_i32_0 : i32, i32
  }
  func.func @transform_8(%arg0: i32) -> (i32, i32) {
    %c0_i32 = arith.constant 0 : i32
    %c0_i32_0 = arith.constant 0 : i32
    %c0_i32_1 = arith.constant 0 : i32
    return %c0_i32, %c0_i32_0 : i32, i32
  }
  func.func @transform_9(%arg0: i32) -> (i32, i32) {
    %c0_i32 = arith.constant 0 : i32
    %c0_i32_0 = arith.constant 0 : i32
    %c0_i32_1 = arith.constant 0 : i32
    return %c0_i32, %c0_i32_0 : i32, i32
  }
  func.func @transform_10(%arg0: i32) -> (i32, i32) {
    %c0_i32 = arith.constant 0 : i32
    %c0_i32_0 = arith.constant 0 : i32
    %c0_i32_1 = arith.constant 0 : i32
    return %c0_i32, %c0_i32_0 : i32, i32
  }
  func.func @transform_11(%arg0: i32) -> (i32, i32) {
    %c0_i32 = arith.constant 0 : i32
    %c0_i32_0 = arith.constant 0 : i32
    %c0_i32_1 = arith.constant 0 : i32
    return %c0_i32, %c0_i32_0 : i32, i32
  }
  func.func @transform_12(%arg0: i32) -> (i32, i32) {
    %c0_i32 = arith.constant 0 : i32
    %c0_i32_0 = arith.constant 0 : i32
    %c0_i32_1 = arith.constant 0 : i32
    return %c0_i32, %c0_i32_0 : i32, i32
  }
}

</mosaic_0001>

<bundles_post_ra>
// kernel: tpu_custom_call.1
= control target key start
LH: loop header
LB: loop body
LE: loop exit
PB: predicated region body
PF: predicated region fallthrough
CT: control target
= control target key end

     0   :  { %s1637_s0 = inlined_call_operand.vmem [shape: f32[16,32], index: 0, kind: input, shape index: {}]   ;;  %s1638_s1 = inlined_call_operand.vmem [shape: f32[16,16], index: 1, kind: input, shape index: {}]   ;;  %s1639_s2 = inlined_call_operand.vmem [shape: f32[32,32], index: 2, kind: input, shape index: {}]   ;;  %s1640_s3 = inlined_call_operand.vmem [shape: f32[1,32], index: 3, kind: input, shape index: {}]   ;;  %s1641_s4 = inlined_call_operand.vmem [shape: f32[32,1], index: 4, kind: input, shape index: {}]   ;;  %s1642_s5 = inlined_call_operand.<no memory space> [shape: f32[1,1], index: 5, kind: input, shape index: {}]   ;;  %s1643_s6 = inlined_call_operand.vmem [shape: f32[1,32], index: 6, kind: input, shape index: {}]   ;;  %s1644_s8 = inlined_call_operand.vmem [shape: f32[32,3], index: 8, kind: input, shape index: {}]   ;;  %s1645_s9 = inlined_call_operand.vmem [shape: f32[1,3], index: 9, kind: input, shape index: {}]   ;;  %s1646_s10 = inlined_call_operand.hbm [shape: f32[16,16], index: 10, kind: output, shape index: {0}]   ;;  %s1647_s11 = inlined_call_operand.hbm [shape: f32[16,32], index: 11, kind: output, shape index: {1}]   ;;  %s1648_s12 = inlined_call_operand.hbm [shape: f32[1,16], index: 12, kind: output, shape index: {2}]   ;;  %s1649_s7 = inlined_call_operand.<no memory space> [shape: f32[1,1], index: 7, kind: input, shape index: {}]  }
   0x1   :  { %v18_v0 = vstv %s1642_s5  ;;  %v20_v1 = vstv %s1649_s7 }
   0x2   :  { %19 = vst [vmem:[#allocation2] sm:$0x1] %v18_v0 }
   0x3   :  { %21 = vst [vmem:[#allocation3] sm:$0x1] %v20_v1 }
   0x4   :  { %22 = vsyncpa [#allocation5], 0  ;;  %v1203_v2 = vld [vmem:[%s1638_s1] sm:$0xff]  ;;  %v1120_v3 = vmov 1.0  }
   0x5   :  { %48 = vxpose.xlu0.b32.start [1/2] (short) (narrow) %v1203_v2, 16  ;;  %101 = vmatpush.msra.mxu0 %v1120_v3 }
   0x6   :  { %1000 = vmatpush.msra.mxu1 %v1120_v3 }
   0x7   :  { %23 = vsyncpa [#allocation7], 0  ;;  %102 = vmatpush.msra.mxu0 %v1120_v3  ;;  %v1209_v4 = vld [vmem:[%s1638_s1 + $0x8] sm:$0xff]  ;;  %vm80_vm0 = vcmask 130048   ;;  %v135_v7 = vld [vmem:[%s1639_s2 + $0x18] sm:$0xff]  ;;  %vm136_vm1 = vcmask 261120  }
   0x8   :  { %1001 = vmatpush.msra.mxu1 %v1120_v3  ;;  %v134_v8 = vld [vmem:[%s1639_s2 + $0x10] sm:$0xff]  ;;  %v133_v9 = vld [vmem:[%s1639_s2 + $0x8] sm:$0xff]  ;;  %v132_v10 = vld [vmem:[%s1639_s2] sm:$0xff]  ;;  %v1121_v13 = vmov 0   ;;  %v209_v45 = vsub.f32 1.0, %v1203_v2  ;;  %v210_v51 = vsub.f32 1.0, %v1209_v4 }
   0x9   :  { %v1235_v11 = vld [vmem:[%s1637_s0] sm:$0xff]  ;;  %v1242_v12 = vld [vmem:[%s1637_s0 + $0x8] sm:$0xff]  ;;  %1012 = vset.pattern.permute.xlu1 %v1121_v13  ;;  %s1122_s16 = smov 126   ;;  %s955_s18 = sshll.u32 %s1647_s11, 4  ;;  %vm934_vm10 = vcmask 122880   ;;  %s956_s18 = int_to_ptr.hbm [resolvable:$true] %s955_s18 }
   0xa   :  { %155 = vmatpush.msrb.mxu1 %v135_v7  ;;  %v1020_v38 = vld [vmem:[%s1640_s3] ss:$0 sm:$0xff]  ;;  %v1260_v46 = vmul.f32 -1e+30, %v209_v45  ;;  %v1277_v59 = vmul.f32 -1e+30, %v210_v51 }
   0xb   :  { %s1124_s19 = smov [#allocation6]   ;;  %s1125_s2 = smov 128  }
   0xc   :  { %156 = vmatpush.msrb.mxu1 %v134_v8  ;;  %s953_s0 = sshll.u32 %s1124_s19, 4  ;;  %s1126_s3 = smov 8   ;;  %s954_s0 = int_to_ptr.vmem [resolvable:$true] %s953_s0 }
   0xd   :  { %49 = vxpose.xlu0.b32.end [2/2] (short) (narrow) %v1209_v4, 16  ;;  %s1127_s20 = smov [#allocation4]   ;;  %s942_s24 = sshll.u32 %s1646_s10, 4  ;;  %s943_s24 = int_to_ptr.hbm [resolvable:$true] %s942_s24 }
   0xe   :  { %157 = vmatpush.msrb.mxu1 %v133_v9  ;;  %s940_s21 = sshll.u32 %s1127_s20, 4  ;;  %s1128_s25 = smov [#allocation8]   ;;  %s941_s21 = int_to_ptr.vmem [resolvable:$true] %s940_s21 }
   0xf   :  { %s967_s26 = sshll.u32 %s1128_s25, 4  ;;  %s969_s5 = sshll.u32 %s1648_s12, 4  ;;  %s968_s26 = int_to_ptr.vmem [resolvable:$true] %s967_s26  ;;  %s970_s5 = int_to_ptr.hbm [resolvable:$true] %s969_s5 }
  0x10   :  { %158 = vmatpush.msrb.mxu1 %v132_v10 }
  0x74   :  { %1013 = vset.pattern.permute.xlu0 %v1121_v13 }
  0xa9   :  { %v1212_v5 = vpop.trf.xlu0 }
  0xaa   :  { %987 = vmatmul.msk.f32.vlgmr.msra.gmra.mxu0 %vm80_vm0, %v1212_v5 }
  0xb1   :  { %v1216_v6 = vpop.trf.xlu0 }
  0xb2   :  { %988 = vmatmul.msk.f32.vlgmr.msra.gmra.mxu1 %vm80_vm0, %v1216_v6 }
  0xba   :  { %989 = vmatmul.msk.f32.vlgmr.msrb.gmra.mxu1 %vm136_vm1, %v1235_v11 }
  0xc2   :  { %990 = vmatmul.msk.f32.gmra.mxu1 %vm136_vm1, %v1242_v12 }
 0x127   :  { %v1246_v14 = vpop.f32.mrf.mxu0 }
 0x128   :  { %v110_v15 = vmax.f32 %v1246_v14, 1e-12 }
 0x12a   :  { %1024 = vrsqrt.f32 %v110_v15  ;;  %vm118_vm6 = vweird.f32 %v110_v15 }
 0x12f   :  { %v1249_v16 = vpop.f32.mrf.mxu1 }
 0x130   :  { %v111_v17 = vmax.f32 %v1249_v16, 1e-12  ;;  %v1025_v18 = vpop.eup %1024 }
 0x131   :  { %v113_v19 = vmul.f32 %v1025_v18, %v110_v15  ;;  %vm119_vm5 = vweird.f32 %v1025_v18 }
 0x132   :  { %1026 = vrsqrt.f32 %v111_v17  ;;  %vm128_vm3 = vweird.f32 %v111_v17  ;;  %vm120_vm7 = vmor %vm118_vm6, %vm119_vm5 }
 0x133   :  { %v114_v22 = vmul.f32 %v1025_v18, %v113_v19 }
 0x135   :  { %v115_v26 = vmul.f32 0.5, %v114_v22 }
 0x137   :  { %v116_v29 = vsub.f32 1.5, %v115_v26  ;;  %v160_v32 = vpop.f32.mrf.mxu1 }
 0x138   :  { %v1027_v20 = vpop.eup %1026 }
 0x139   :  { %v123_v21 = vmul.f32 %v1027_v20, %v111_v17  ;;  %vm129_vm2 = vweird.f32 %v1027_v20  ;;  %v117_v30 = vmul.f32 %v1025_v18, %v116_v29 }
 0x13a   :  { %vm130_vm4 = vmor %vm128_vm3, %vm129_vm2 }
 0x13b   :  { %v124_v23 = vmul.f32 %v1027_v20, %v123_v21  ;;  %v121_v31 = vsel %vm120_vm7, %v1025_v18, %v117_v30 }
 0x13d   :  { %v125_v24 = vmul.f32 0.5, %v124_v23 }
 0x13f   :  { %v126_v25 = vsub.f32 1.5, %v125_v24  ;;  %v163_v33 = vpop.f32.mrf.mxu1 }
 0x141   :  { %v127_v27 = vmul.f32 %v1027_v20, %v126_v25 }
 0x143   :  { %v131_v28 = vsel %vm130_vm4, %v1027_v20, %v127_v27 }
 0x144   :  { %173 = vperm.xlu1 %1012, %v131_v28  }
 0x14c   :  { %168 = vperm.xlu1 %1012, %v121_v31  }
 0x1b6   :  { %v174_v34 = vpop.permute.xlu1 %173 }
 0x1b7   :  { %v177_v35 = vmul.f32 %v174_v34, %v163_v33 }
 0x1b9   :  { %192 = vmatpush.msra.mxu2 %v177_v35 }
 0x1be   :  { %v169_v36 = vpop.permute.xlu1 %168 }
 0x1bf   :  { %v176_v37 = vmul.f32 %v169_v36, %v160_v32 }
 0x1c1   :  { %193 = vmatpush.msra.mxu2 %v176_v37 }
 0x1c2   :  { %991 = vmatmul.msk.f32.vlgmr.msra.gmra.mxu2 %vm80_vm0, %v1212_v5 }
 0x1ca   :  { %992 = vmatmul.msk.f32.gmra.mxu2 %vm80_vm0, %v1216_v6 }
 0x245   :  { %v195_v39 = vpop.f32.mrf.mxu2 }
 0x246   :  { %v201_v40 = vmul.f32 %v195_v39, %v169_v36 }
 0x248   :  { %v207_v41 = vadd.f32 %v1020_v38, %v201_v40 }
 0x24a   :  { %213 = vxpose.xlu2.b32.start [1/2] (short) (narrow) %v207_v41, 32 }
 0x24d   :  { %v198_v42 = vpop.f32.mrf.mxu2 }
 0x24e   :  { %v202_v43 = vmul.f32 %v198_v42, %v174_v34 }
 0x250   :  { %v208_v44 = vadd.f32 %v1020_v38, %v202_v43 }
 0x252   :  { %214 = vxpose.xlu2.b32.end [2/2] (short) (narrow) %v208_v44, 32 }
 0x2b4   :  { %1014 = vset.pattern.permute.xlu2 %v1121_v13 }
 0x2e3   :  { %v1262_v47 = vpop.trf.xlu2 }
 0x2e4   :  { %v277_v48 = vperm.slane %v1262_v47, 2  ;;  %v263_v49 = vperm.slane %v1262_v47, 1  ;;  %v249_v50 = vperm.slane %v1262_v47, 0  ;;  %v291_v58 = vperm.slane %v1262_v47, 3 }
 0x2e5   :  { %v305_v60 = vperm.slane %v1262_v47, 4  ;;  %v319_v2 = vperm.slane %v1262_v47, 5  ;;  %v333_v10 = vperm.slane %v1262_v47, 6 }
 0x2e6   :  { %v278_v52 = vadd.f32 %v277_v48, %v1260_v46  ;;  %v264_v53 = vadd.f32 %v263_v49, %v1260_v46  ;;  %v250_v54 = vadd.f32 %v249_v50, %v1260_v46  ;;  %v292_v62 = vadd.f32 %v291_v58, %v1260_v46 }
 0x2e7   :  { %v307_v63 = vadd.f32 %v305_v60, %v1277_v59  ;;  %v306_v4 = vadd.f32 %v305_v60, %v1260_v46  ;;  %v321_v7 = vadd.f32 %v319_v2, %v1277_v59  ;;  %v251_v18 = vadd.f32 %v249_v50, %v1277_v59 }
 0x2e8   :  { %v280_v55 = vsel %vm80_vm0, %v278_v52, -inf  ;;  %v266_v56 = vsel %vm80_vm0, %v264_v53, -inf  ;;  %v252_v57 = vsel %vm80_vm0, %v250_v54, -inf  ;;  %v294_v0 = vsel %vm80_vm0, %v292_v62, -inf }
 0x2e9   :  { %281 = vmax.xlane.f32.xlu2 %v280_v55  ;;  %267 = vmax.xlane.f32.xlu1 %v266_v56  ;;  %v311_v1 = vsel %vm80_vm0, %v307_v63, -inf  ;;  %v308_v8 = vsel %vm80_vm0, %v306_v4, -inf  ;;  %v325_v9 = vsel %vm80_vm0, %v321_v7, -inf  ;;  %v335_v19 = vadd.f32 %v333_v10, %v1277_v59 }
 0x2ea   :  { %253 = vmax.xlane.f32.xlu0 %v252_v57  ;;  %v255_v21 = vsel %vm80_vm0, %v251_v18, -inf  ;;  %v265_v27 = vadd.f32 %v263_v49, %v1277_v59  ;;  %v279_v41 = vadd.f32 %v277_v48, %v1277_v59  ;;  %v334_v51 = vadd.f32 %v333_v10, %v1260_v46 }
 0x2eb   :  { %v1280_v61 = vpop.trf.xlu2  ;;  %v339_v22 = vsel %vm80_vm0, %v335_v19, -inf  ;;  %v293_v57 = vadd.f32 %v291_v58, %v1277_v59 }
 0x2ec   :  { %v389_v13 = vperm.slane %v1280_v61, 2  ;;  %v403_v23 = vperm.slane %v1280_v61, 3  ;;  %v361_v24 = vperm.slane %v1280_v61, 0  ;;  %v269_v30 = vsel %vm80_vm0, %v265_v27, -inf }
 0x2ed   :  { %v375_v31 = vperm.slane %v1280_v61, 1  ;;  %v431_v32 = vperm.slane %v1280_v61, 5  ;;  %v445_v37 = vperm.slane %v1280_v61, 6  ;;  %v283_v43 = vsel %vm80_vm0, %v279_v41, -inf }
 0x2ee   :  { %v390_v17 = vadd.f32 %v389_v13, %v1260_v46  ;;  %v404_v25 = vadd.f32 %v403_v23, %v1260_v46  ;;  %v363_v26 = vadd.f32 %v361_v24, %v1277_v59  ;;  %v405_v38 = vadd.f32 %v403_v23, %v1277_v59 }
 0x2ef   :  { %v432_v33 = vadd.f32 %v431_v32, %v1260_v46  ;;  %v446_v39 = vadd.f32 %v445_v37, %v1260_v46  ;;  %v417_v44 = vperm.slane %v1280_v61, 4  ;;  %v447_v45 = vadd.f32 %v445_v37, %v1277_v59 }
 0x2f0   :  { %v392_v20 = vsel %vm80_vm0, %v390_v17, -inf  ;;  %v367_v28 = vsel %vm80_vm0, %v363_v26, -inf  ;;  %v406_v29 = vsel %vm80_vm0, %v404_v25, -inf  ;;  %v409_v40 = vsel %vm80_vm0, %v405_v38, -inf }
 0x2f1   :  { %295 = vmax.xlane.f32.xlu1 %v294_v0  ;;  %393 = vmax.xlane.f32.xlu2 %v392_v20  ;;  %v434_v34 = vsel %vm80_vm0, %v432_v33, -inf  ;;  %v448_v42 = vsel %vm80_vm0, %v446_v39, -inf  ;;  %v419_v49 = vadd.f32 %v417_v44, %v1277_v59  ;;  %v451_v50 = vsel %vm80_vm0, %v447_v45, -inf  ;;  %v1425_v45 = vld [vmem:[%s1641_s4] sm:$0xff] }
 0x2f2   :  { %312 = vmax.xlane.f32.xlu0 %v311_v1  ;;  %v459_v52 = vperm.slane %v1280_v61, 7  ;;  %v336_v53 = vsel %vm80_vm0, %v334_v51, -inf  ;;  %v297_v63 = vsel %vm80_vm0, %v293_v57, -inf  ;;  %v347_v0 = vperm.slane %v1262_v47, 7 }
 0x2f3   :  { %v1289_v3 = vpop.trf.xlu2  ;;  %v423_v48 = vsel %vm80_vm0, %v419_v49, -inf  ;;  %v362_v23 = vadd.f32 %v361_v24, %v1260_v46  ;;  %v418_v38 = vadd.f32 %v417_v44, %v1260_v46  ;;  %v391_v44 = vadd.f32 %v389_v13, %v1277_v59 }
 0x2f4   :  { %v473_v54 = vperm.slane %v1289_v3, 0  ;;  %v461_v55 = vadd.f32 %v459_v52, %v1277_v59  ;;  %v487_v1 = vperm.slane %v1289_v3, 1  ;;  %v348_v7 = vadd.f32 %v347_v0, %v1260_v46 }
 0x2f5   :  { %v529_v10 = vperm.slane %v1289_v3, 4  ;;  %v349_v20 = vadd.f32 %v347_v0, %v1277_v59  ;;  %v364_v25 = vsel %vm80_vm0, %v362_v23, -inf  ;;  %v501_v26 = vperm.slane %v1289_v3, 2 }
 0x2f6   :  { %v474_v56 = vadd.f32 %v473_v54, %v1260_v46  ;;  %v465_v62 = vsel %vm80_vm0, %v461_v55, -inf  ;;  %v488_v4 = vadd.f32 %v487_v1, %v1260_v46  ;;  %v489_v17 = vadd.f32 %v487_v1, %v1277_v59 }
 0x2f7   :  { %v530_v18 = vadd.f32 %v529_v10, %v1260_v46  ;;  %v557_v27 = vperm.slane %v1289_v3, 6  ;;  %v571_v33 = vperm.slane %v1289_v3, 7  ;;  %v395_v49 = vsel %vm80_vm0, %v391_v44, -inf }
 0x2f8   :  { %v476_v60 = vsel %vm80_vm0, %v474_v56, -inf  ;;  %v493_v19 = vsel %vm80_vm0, %v489_v17, -inf  ;;  %v460_v57 = vadd.f32 %v459_v52, %v1260_v46  ;;  %v300_v52 = vperm.slane %v1425_v45, 3 }
 0x2f9   :  { %309 = vmax.xlane.f32.xlu1 %v308_v8  ;;  %368 = vmax.xlane.f32.xlu2 %v367_v28  ;;  %v503_v28 = vadd.f32 %v501_v26, %v1277_v59  ;;  %v573_v39 = vadd.f32 %v571_v33, %v1277_v59 }
 0x2fa   :  { %326 = vmax.xlane.f32.xlu0 %v325_v9  ;;  %v490_v9 = vsel %vm80_vm0, %v488_v4, -inf  ;;  %v286_v4 = vperm.slane %v1425_v45, 2 }
 0x2fb   :  { %v1297_v15 = vpop.trf.xlu2 }
 0x2fc   :  { %719 = vmatpush.msra.mxu3 %v1297_v15  ;;  %v613_v51 = vperm.slane %v1297_v15, 2 }
 0x2fe   :  { %720 = vmatpush.msra.mxu3 %v1289_v3  ;;  %v614_v13 = vadd.f32 %v613_v51, %v1260_v46 }
 0x300   :  { %721 = vmatpush.msra.mxu3 %v1280_v61  ;;  %v314_v61 = vperm.slane %v1425_v45, 4 }
 0x301   :  { %256 = vmax.xlane.f32.xlu1 %v255_v21  ;;  %435 = vmax.xlane.f32.xlu2 %v434_v34  ;;  %v532_v21 = vsel %vm80_vm0, %v530_v18, -inf }
 0x302   :  { %340 = vmax.xlane.f32.xlu0 %v339_v22  ;;  %722 = vmatpush.msra.mxu3 %v1262_v47  ;;  %v350_v47 = vsel %vm80_vm0, %v348_v7, -inf  ;;  %v353_v22 = vsel %vm80_vm0, %v349_v20, -inf  ;;  %v433_v20 = vadd.f32 %v431_v32, %v1277_v59 }
 0x304   :  { %799 = vmatpush.msrb.mxu3 %v1242_v12  ;;  %v377_v12 = vadd.f32 %v375_v31, %v1277_v59 }
 0x306   :  { %800 = vmatpush.msrb.mxu3 %v1235_v11  ;;  %v320_v11 = vadd.f32 %v319_v2, %v1260_v46  ;;  %v381_v35 = vsel %vm80_vm0, %v377_v12, -inf  ;;  %v515_v2 = vperm.slane %v1289_v3, 3  ;;  %v376_v12 = vadd.f32 %v375_v31, %v1260_v46 }
 0x307   :  { %v543_v31 = vperm.slane %v1289_v3, 5 }
 0x308   :  { %v322_v36 = vsel %vm80_vm0, %v320_v11, -inf  ;;  %v516_v58 = vadd.f32 %v515_v2, %v1260_v46  ;;  %v531_v11 = vadd.f32 %v529_v10, %v1277_v59  ;;  %v378_v34 = vsel %vm80_vm0, %v376_v12, -inf }
 0x309   :  { %270 = vmax.xlane.f32.xlu1 %v269_v30  ;;  %410 = vmax.xlane.f32.xlu2 %v409_v40  ;;  %v507_v30 = vsel %vm80_vm0, %v503_v28, -inf  ;;  %v420_v40 = vsel %vm80_vm0, %v418_v38, -inf  ;;  %v545_v41 = vadd.f32 %v543_v31, %v1277_v59  ;;  %v683_v38 = vperm.slane %v1297_v15, 7 }
 0x30a   :  { %407 = vmax.xlane.f32.xlu0 %v406_v29  ;;  %v518_v8 = vsel %vm80_vm0, %v516_v58, -inf  ;;  %v558_v29 = vadd.f32 %v557_v27, %v1260_v46 }
 0x30c   :  { %v560_v24 = vsel %vm80_vm0, %v558_v29, -inf  ;;  %v437_v29 = vsel %vm80_vm0, %v433_v20, -inf }
 0x311   :  { %323 = vmax.xlane.f32.xlu1 %v322_v36  ;;  %452 = vmax.xlane.f32.xlu2 %v451_v50  ;;  %v535_v36 = vsel %vm80_vm0, %v531_v11, -inf  ;;  %v272_v50 = vperm.slane %v1425_v45, 1  ;;  %v502_v11 = vadd.f32 %v501_v26, %v1260_v46 }
 0x312   :  { %382 = vmax.xlane.f32.xlu0 %v381_v35  ;;  %v572_v35 = vadd.f32 %v571_v33, %v1260_v46 }
 0x314   :  { %v574_v37 = vsel %vm80_vm0, %v572_v35, -inf }
 0x319   :  { %284 = vmax.xlane.f32.xlu1 %v283_v43  ;;  %477 = vmax.xlane.f32.xlu2 %v476_v60  ;;  %v549_v43 = vsel %vm80_vm0, %v545_v41, -inf }
 0x31a   :  { %449 = vmax.xlane.f32.xlu0 %v448_v42  ;;  %v577_v42 = vsel %vm80_vm0, %v573_v39, -inf  ;;  %v627_v39 = vperm.slane %v1297_v15, 3 }
 0x31c   :  { %v629_v26 = vadd.f32 %v627_v39, %v1277_v59 }
 0x31e   :  { %v633_v44 = vsel %vm80_vm0, %v629_v26, -inf }
 0x321   :  { %337 = vmax.xlane.f32.xlu1 %v336_v53  ;;  %519 = vmax.xlane.f32.xlu2 %v518_v8  ;;  %v258_v53 = vperm.slane %v1425_v45, 0  ;;  %v462_v8 = vsel %vm80_vm0, %v460_v57, -inf }
 0x322   :  { %424 = vmax.xlane.f32.xlu0 %v423_v48  ;;  %v599_v48 = vperm.slane %v1297_v15, 1 }
 0x324   :  { %v600_v55 = vadd.f32 %v599_v48, %v1260_v46 }
 0x326   :  { %v602_v0 = vsel %vm80_vm0, %v600_v55, -inf }
 0x329   :  { %298 = vmax.xlane.f32.xlu1 %v297_v63  ;;  %494 = vmax.xlane.f32.xlu2 %v493_v19  ;;  %v616_v63 = vsel %vm80_vm0, %v614_v13, -inf }
 0x32a   :  { %466 = vmax.xlane.f32.xlu0 %v465_v62 }
 0x331   :  { %351 = vmax.xlane.f32.xlu1 %v350_v47  ;;  %561 = vmax.xlane.f32.xlu2 %v560_v24  ;;  %v585_v47 = vperm.slane %v1297_v15, 0  ;;  %v655_v24 = vperm.slane %v1297_v15, 5 }
 0x332   :  { %491 = vmax.xlane.f32.xlu0 %v490_v9  ;;  %v641_v9 = vperm.slane %v1297_v15, 4 }
 0x333   :  { %v587_v18 = vadd.f32 %v585_v47, %v1277_v59  ;;  %v656_v12 = vadd.f32 %v655_v24, %v1260_v46 }
 0x334   :  { %v642_v17 = vadd.f32 %v641_v9, %v1260_v46 }
 0x335   :  { %v658_v35 = vsel %vm80_vm0, %v656_v12, -inf }
 0x336   :  { %v644_v23 = vsel %vm80_vm0, %v642_v17, -inf }
 0x339   :  { %354 = vmax.xlane.f32.xlu1 %v353_v22  ;;  %536 = vmax.xlane.f32.xlu2 %v535_v36 }
 0x33a   :  { %533 = vmax.xlane.f32.xlu0 %v532_v21 }
 0x341   :  { %365 = vmax.xlane.f32.xlu1 %v364_v25  ;;  %578 = vmax.xlane.f32.xlu2 %v577_v42  ;;  %v591_v25 = vsel %vm80_vm0, %v587_v18, -inf  ;;  %v475_v42 = vadd.f32 %v473_v54, %v1277_v59  ;;  %v559_v18 = vadd.f32 %v557_v27, %v1277_v59 }
 0x342   :  { %508 = vmax.xlane.f32.xlu0 %v507_v30  ;;  %v615_v30 = vadd.f32 %v613_v51, %v1277_v59  ;;  %v657_v51 = vadd.f32 %v655_v24, %v1277_v59  ;;  %v628_v24 = vadd.f32 %v627_v39, %v1260_v46  ;;  %v601_v39 = vadd.f32 %v599_v48, %v1277_v59 }
 0x343   :  { %v479_v13 = vsel %vm80_vm0, %v475_v42, -inf }
 0x344   :  { %v619_v32 = vsel %vm80_vm0, %v615_v30, -inf  ;;  %v661_v54 = vsel %vm80_vm0, %v657_v51, -inf }
 0x349   :  { %379 = vmax.xlane.f32.xlu1 %v378_v34  ;;  %603 = vmax.xlane.f32.xlu2 %v602_v0 }
 0x34a   :  { %575 = vmax.xlane.f32.xlu0 %v574_v37  ;;  %v504_v37 = vsel %vm80_vm0, %v502_v11, -inf }
 0x351   :  { %421 = vmax.xlane.f32.xlu1 %v420_v40  ;;  %645 = vmax.xlane.f32.xlu2 %v644_v23  ;;  %v684_v40 = vadd.f32 %v683_v38, %v1260_v46  ;;  %v342_v23 = vperm.slane %v1425_v45, 6 }
 0x352   :  { %550 = vmax.xlane.f32.xlu0 %v549_v43 }
 0x353   :  { %v686_v43 = vsel %vm80_vm0, %v684_v40, -inf }
 0x359   :  { %396 = vmax.xlane.f32.xlu1 %v395_v49  ;;  %620 = vmax.xlane.f32.xlu2 %v619_v32  ;;  %v669_v49 = vperm.slane %v1297_v15, 6 }
 0x35a   :  { %617 = vmax.xlane.f32.xlu0 %v616_v63 }
 0x35b   :  { %v671_v55 = vadd.f32 %v669_v49, %v1277_v59  ;;  %v670_v48 = vadd.f32 %v669_v49, %v1260_v46 }
 0x35c   :  { %v268_v56 = vpop.xlane.xlu1 %267  ;;  %v282_v7 = vpop.xlane.xlu2 %281 }
 0x35d   :  { %v273_v60 = vmul.f32 %v272_v50, %v268_v56  ;;  %v254_v62 = vpop.xlane.xlu0 %253  ;;  %v287_v10 = vmul.f32 %v286_v4, %v282_v7  ;;  %v675_v56 = vsel %vm80_vm0, %v671_v55, -inf }
 0x35e   :  { %v259_v1 = vmul.f32 %v258_v53, %v254_v62 }
 0x360   :  { %v275_v58 = vadd.f32 %v273_v60, %v259_v1  ;;  %v544_v60 = vadd.f32 %v543_v31, %v1260_v46 }
 0x361   :  { %463 = vmax.xlane.f32.xlu1 %v462_v8  ;;  %687 = vmax.xlane.f32.xlu2 %v686_v43  ;;  %v517_v8 = vadd.f32 %v515_v2, %v1277_v59  ;;  %v586_v2 = vadd.f32 %v585_v47, %v1260_v46 }
 0x362   :  { %v289_v21 = vadd.f32 %v287_v10, %v275_v58  ;;  %592 = vmax.xlane.f32.xlu0 %v591_v25  ;;  %v546_v1 = vsel %vm80_vm0, %v544_v60, -inf  ;;  %v328_v58 = vperm.slane %v1425_v45, 5 }
 0x364   :  { %v296_v19 = vpop.xlane.xlu1 %295  ;;  %v394_v27 = vpop.xlane.xlu2 %393 }
 0x365   :  { %v301_v22 = vmul.f32 %v300_v52, %v296_v19  ;;  %v313_v17 = vpop.xlane.xlu0 %312 }
 0x366   :  { %v316_v12 = vmul.f32 %v314_v61, %v313_v17 }
 0x367   :  { %v303_v28 = vadd.f32 %v301_v22, %v289_v21  ;;  %v563_v21 = vsel %vm80_vm0, %v559_v18, -inf  ;;  %v685_v18 = vadd.f32 %v683_v38, %v1277_v59 }
 0x369   :  { %438 = vmax.xlane.f32.xlu1 %v437_v29  ;;  %676 = vmax.xlane.f32.xlu2 %v675_v56  ;;  %v588_v29 = vsel %vm80_vm0, %v586_v2, -inf }
 0x36a   :  { %659 = vmax.xlane.f32.xlu0 %v658_v35  ;;  %v356_v35 = vperm.slane %v1425_v45, 7 }
 0x36c   :  { %v310_v33 = vpop.xlane.xlu1 %309  ;;  %v369_v42 = vpop.xlane.xlu2 %368 }
 0x36d   :  { %v315_v34 = vmul.f32 %v314_v61, %v310_v33  ;;  %v327_v22 = vpop.xlane.xlu0 %326  ;;  %v630_v33 = vsel %vm80_vm0, %v628_v24, -inf  ;;  %v1534_v61 = vld [vmem:[%s1641_s4 + $0x8] sm:$0xff] }
 0x36e   :  { %v330_v11 = vmul.f32 %v328_v58, %v327_v22  ;;  %v370_v45 = vperm.slane %v1534_v61, 0  ;;  %v384_v51 = vperm.slane %v1534_v61, 1  ;;  %v689_v22 = vsel %vm80_vm0, %v685_v18, -inf }
 0x36f   :  { %v317_v36 = vadd.f32 %v315_v34, %v303_v28  ;;  %v412_v38 = vperm.slane %v1534_v61, 3 }
 0x370   :  { %v372_v55 = vmul.f32 %v370_v45, %v369_v42  ;;  %v1563_v42 = vld [vmem:[%s1641_s4 + $0x10] sm:$0xff] }
 0x371   :  { %505 = vmax.xlane.f32.xlu1 %v504_v37  ;;  %v524_v18 = vperm.slane %v1563_v42, 3 }
 0x372   :  { %634 = vmax.xlane.f32.xlu0 %v633_v44  ;;  %v605_v44 = vsel %vm80_vm0, %v601_v39, -inf }
 0x374   :  { %v257_v41 = vpop.xlane.xlu1 %256 }
 0x375   :  { %v260_v62 = vmul.f32 %v258_v53, %v257_v41  ;;  %v521_v53 = vsel %vm80_vm0, %v517_v8, -inf  ;;  %v341_v30 = vpop.xlane.xlu0 %340 }
 0x379   :  { %480 = vmax.xlane.f32.xlu1 %v479_v13 }
 0x37a   :  { %662 = vmax.xlane.f32.xlu0 %v661_v54 }
 0x37c   :  { %v271_v57 = vpop.xlane.xlu1 %270 }
 0x37d   :  { %v274_v63 = vmul.f32 %v272_v50, %v271_v57  ;;  %v408_v40 = vpop.xlane.xlu0 %407 }
 0x37f   :  { %v276_v0 = vadd.f32 %v274_v63, %v260_v62  ;;  %v436_v62 = vpop.xlane.xlu2 %435  ;;  %v672_v63 = vsel %vm80_vm0, %v670_v48, -inf }
 0x381   :  { %547 = vmax.xlane.f32.xlu1 %v546_v1 }
 0x384   :  { %v324_v7 = vpop.xlane.xlu1 %323 }
 0x385   :  { %v329_v31 = vmul.f32 %v328_v58, %v324_v7  ;;  %v383_v54 = vpop.xlane.xlu0 %382  ;;  %v643_v7 = vadd.f32 %v641_v9, %v1277_v59 }
 0x386   :  { %v386_v57 = vmul.f32 %v384_v51, %v383_v54 }
 0x387   :  { %v331_v10 = vadd.f32 %v329_v31, %v317_v36  ;;  %v344_v36 = vmul.f32 %v342_v23, %v341_v30  ;;  %v647_v49 = vsel %vm80_vm0, %v643_v7, -inf  ;;  %v411_v17 = vpop.xlane.xlu2 %410 }
 0x389   :  { %522 = vmax.xlane.f32.xlu1 %v521_v53  ;;  %v398_v53 = vperm.slane %v1534_v61, 2 }
 0x38c   :  { %v285_v50 = vpop.xlane.xlu1 %284 }
 0x38d   :  { %v288_v19 = vmul.f32 %v286_v4, %v285_v50 }
 0x38f   :  { %v290_v20 = vadd.f32 %v288_v19, %v276_v0 }
 0x391   :  { %564 = vmax.xlane.f32.xlu1 %v563_v21 }
 0x394   :  { %v338_v25 = vpop.xlane.xlu1 %337 }
 0x395   :  { %v343_v28 = vmul.f32 %v342_v23, %v338_v25  ;;  %v453_v23 = vpop.xlane.xlu2 %452 }
 0x397   :  { %v345_v3 = vadd.f32 %v343_v28, %v331_v10  ;;  %v450_v10 = vpop.xlane.xlu0 %449 }
 0x399   :  { %589 = vmax.xlane.f32.xlu1 %v588_v29 }
 0x39c   :  { %v299_v4 = vpop.xlane.xlu1 %298 }
 0x39d   :  { %v302_v32 = vmul.f32 %v300_v52, %v299_v4 }
 0x39f   :  { %v304_v47 = vadd.f32 %v302_v32, %v290_v20  ;;  %v399_v20 = vmul.f32 %v398_v53, %v394_v27  ;;  %v425_v2 = vpop.xlane.xlu0 %424 }
 0x3a1   :  { %v318_v34 = vadd.f32 %v316_v12, %v304_v47  ;;  %631 = vmax.xlane.f32.xlu1 %v630_v33  ;;  %v426_v47 = vperm.slane %v1534_v61, 4  ;;  %v413_v33 = vmul.f32 %v412_v38, %v408_v40 }
 0x3a3   :  { %v332_v37 = vadd.f32 %v330_v11, %v318_v34  ;;  %v428_v7 = vmul.f32 %v426_v47, %v425_v2 }
 0x3a4   :  { %v352_v26 = vpop.xlane.xlu1 %351 }
 0x3a5   :  { %v357_v52 = vmul.f32 %v356_v35, %v352_v26  ;;  %v346_v41 = vadd.f32 %v344_v36, %v332_v37 }
 0x3a7   :  { %v359_v43 = vadd.f32 %v357_v52, %v345_v3  ;;  %v467_v28 = vpop.xlane.xlu0 %466  ;;  %v478_v3 = vpop.xlane.xlu2 %477 }
 0x3a9   :  { %606 = vmax.xlane.f32.xlu1 %v605_v44 }
 0x3ac   :  { %v355_v13 = vpop.xlane.xlu1 %354 }
 0x3ad   :  { %v358_v56 = vmul.f32 %v356_v35, %v355_v13  ;;  %v440_v35 = vperm.slane %v1534_v61, 5 }
 0x3af   :  { %v360_v60 = vadd.f32 %v358_v56, %v346_v41  ;;  %v492_v30 = vpop.xlane.xlu0 %491  ;;  %v520_v24 = vpop.xlane.xlu2 %519  ;;  %v441_v52 = vmul.f32 %v440_v35, %v436_v62  ;;  %v454_v41 = vperm.slane %v1534_v61, 6  ;;  %v496_v62 = vperm.slane %v1563_v42, 1 }
 0x3b0   :  { %v525_v2 = vmul.f32 %v524_v18, %v520_v24 }
 0x3b1   :  { %v374_v0 = vadd.f32 %v372_v55, %v360_v60  ;;  %673 = vmax.xlane.f32.xlu1 %v672_v63 }
 0x3b3   :  { %v388_v1 = vadd.f32 %v386_v57, %v374_v0  ;;  %v414_v57 = vmul.f32 %v412_v38, %v411_v17 }
 0x3b4   :  { %v366_v58 = vpop.xlane.xlu1 %365 }
 0x3b5   :  { %v371_v8 = vmul.f32 %v370_v45, %v366_v58  ;;  %v455_v45 = vmul.f32 %v454_v41, %v450_v10 }
 0x3b7   :  { %v373_v31 = vadd.f32 %v371_v8, %v359_v43  ;;  %v534_v12 = vpop.xlane.xlu0 %533  ;;  %v1552_v15 = vpop.xlane.xlu2 %494  ;;  %v468_v43 = vperm.slane %v1534_v61, 7  ;;  %v497_v8 = vmul.f32 %v496_v62, %v492_v30  ;;  %v510_v61 = vperm.slane %v1563_v42, 2 }
 0x3b8   :  { %v552_v30 = vperm.slane %v1563_v42, 5  ;;  %v498_v24 = vmul.f32 %v496_v62, %v1552_v15 }
 0x3b9   :  { %648 = vmax.xlane.f32.xlu1 %v647_v49  ;;  %v703_v49 = vld [vmem:[%s1643_s6] sm:$0x1] }
 0x3ba   :  { %993 = vmatmul.msk.f32.vlgmr.msra.gmra.mxu3 %vm136_vm1, %v703_v49 }
 0x3bc   :  { %v380_v50 = vpop.xlane.xlu1 %379 }
 0x3bd   :  { %v385_v19 = vmul.f32 %v384_v51, %v380_v50  ;;  %v482_v51 = vperm.slane %v1563_v42, 0 }
 0x3bf   :  { %v387_v21 = vadd.f32 %v385_v19, %v373_v31  ;;  %v1556_v34 = vpop.xlane.xlu0 %508  ;;  %v562_v26 = vpop.xlane.xlu2 %561  ;;  %v483_v60 = vmul.f32 %v482_v51, %v478_v3  ;;  %v470_v3 = vmul.f32 %v468_v43, %v467_v28  ;;  %v1581_v28 = vld [vmem:[%s1641_s4 + $0x18] sm:$0xff] }
 0x3c1   :  { %v401_v9 = vadd.f32 %v399_v20, %v387_v21  ;;  %690 = vmax.xlane.f32.xlu1 %v689_v22  ;;  %v456_v21 = vmul.f32 %v454_v41, %v453_v23 }
 0x3c3   :  { %v415_v36 = vadd.f32 %v413_v33, %v401_v9 }
 0x3c4   :  { %v422_v25 = vpop.xlane.xlu1 %421 }
 0x3c5   :  { %v427_v11 = vmul.f32 %v426_v47, %v422_v25  ;;  %v538_v25 = vperm.slane %v1563_v42, 4 }
 0x3c7   :  { %v429_v37 = vadd.f32 %v427_v11, %v415_v36  ;;  %v576_v48 = vpop.xlane.xlu0 %575  ;;  %v537_v0 = vpop.xlane.xlu2 %536  ;;  %v539_v47 = vmul.f32 %v538_v25, %v534_v12 }
 0x3c9   :  { %v443_v40 = vadd.f32 %v441_v52, %v429_v37 }
 0x3cb   :  { %v457_v56 = vadd.f32 %v455_v45, %v443_v40  ;;  %v512_v40 = vmul.f32 %v510_v61, %v1556_v34  ;;  %v594_v45 = vperm.slane %v1581_v28, 0 }
 0x3cc   :  { %v397_v29 = vpop.xlane.xlu1 %396 }
 0x3cd   :  { %v400_v44 = vmul.f32 %v398_v53, %v397_v29 }
 0x3cf   :  { %v402_v55 = vadd.f32 %v400_v44, %v388_v1  ;;  %v551_v53 = vpop.xlane.xlu0 %550  ;;  %v579_v9 = vpop.xlane.xlu2 %578 }
 0x3d1   :  { %v416_v58 = vadd.f32 %v414_v57, %v402_v55 }
 0x3d3   :  { %v430_v1 = vadd.f32 %v428_v7, %v416_v58  ;;  %v622_v58 = vperm.slane %v1581_v28, 2 }
 0x3d4   :  { %v464_v4 = vpop.xlane.xlu1 %463 }
 0x3d5   :  { %v469_v13 = vmul.f32 %v468_v43, %v464_v4 }
 0x3d7   :  { %v471_v63 = vadd.f32 %v469_v13, %v457_v56  ;;  %v618_v38 = vpop.xlane.xlu0 %617  ;;  %v604_v37 = vpop.xlane.xlu2 %603 }
 0x3d8   :  { %v623_v49 = vmul.f32 %v622_v58, %v618_v38 }
 0x3d9   :  { %v485_v31 = vadd.f32 %v483_v60, %v471_v63 }
 0x3db   :  { %v499_v20 = vadd.f32 %v497_v8, %v485_v31  ;;  %v554_v8 = vmul.f32 %v552_v30, %v551_v53  ;;  %v636_v31 = vperm.slane %v1581_v28, 3 }
 0x3dc   :  { %v439_v32 = vpop.xlane.xlu1 %438 }
 0x3dd   :  { %v442_v10 = vmul.f32 %v440_v35, %v439_v32  ;;  %v566_v35 = vperm.slane %v1563_v42, 6 }
 0x3df   :  { %v444_v19 = vadd.f32 %v442_v10, %v430_v1  ;;  %v567_v41 = vmul.f32 %v566_v35, %v562_v26  ;;  %v593_v13 = vpop.xlane.xlu0 %592  ;;  %v646_v62 = vpop.xlane.xlu2 %645  ;;  %v540_v26 = vmul.f32 %v538_v25, %v537_v0  ;;  %v1022_v0 = vld [vmem:[#allocation3] ss:$0 sm:$0xff] }
 0x3e0   :  { %744 = vperm.xlu2 %1014, %v1022_v0   ;;  %v596_v25 = vmul.f32 %v594_v45, %v593_v13 }
 0x3e1   :  { %v458_v29 = vadd.f32 %v456_v21, %v444_v19 }
 0x3e3   :  { %v472_v33 = vadd.f32 %v470_v3, %v458_v29  ;;  %v664_v29 = vperm.slane %v1581_v28, 5 }
 0x3e4   :  { %v506_v27 = vpop.xlane.xlu1 %505 }
 0x3e5   :  { %v511_v17 = vmul.f32 %v510_v61, %v506_v27 }
 0x3e7   :  { %v513_v22 = vadd.f32 %v511_v17, %v499_v20  ;;  %v621_v20 = vpop.xlane.xlu2 %620 }
 0x3e9   :  { %v527_v4 = vadd.f32 %v525_v2, %v513_v22 }
 0x3eb   :  { %v541_v23 = vadd.f32 %v539_v47, %v527_v4  ;;  %v678_v47 = vperm.slane %v1581_v28, 6 }
 0x3ec   :  { %v481_v39 = vpop.xlane.xlu1 %480 }
 0x3ed   :  { %v484_v32 = vmul.f32 %v482_v51, %v481_v39  ;;  %v580_v39 = vperm.slane %v1563_v42, 7 }
 0x3ef   :  { %v486_v36 = vadd.f32 %v484_v32, %v472_v33  ;;  %v581_v55 = vmul.f32 %v580_v39, %v576_v48  ;;  %v660_v48 = vpop.xlane.xlu0 %659  ;;  %v582_v22 = vmul.f32 %v580_v39, %v579_v9 }
 0x3f0   :  { %v665_v38 = vmul.f32 %v664_v29, %v660_v48 }
 0x3f1   :  { %v500_v43 = vadd.f32 %v498_v24, %v486_v36 }
 0x3f3   :  { %v514_v15 = vadd.f32 %v512_v40, %v500_v43 }
 0x3f4   :  { %v548_v54 = vpop.xlane.xlu1 %547 }
 0x3f5   :  { %v553_v11 = vmul.f32 %v552_v30, %v548_v54  ;;  %v608_v54 = vperm.slane %v1581_v28, 1 }
 0x3f7   :  { %v555_v52 = vadd.f32 %v553_v11, %v541_v23  ;;  %v609_v7 = vmul.f32 %v608_v54, %v604_v37  ;;  %v635_v32 = vpop.xlane.xlu0 %634  ;;  %v688_v23 = vpop.xlane.xlu2 %687  ;;  %v624_v37 = vmul.f32 %v622_v58, %v621_v20 }
 0x3f9   :  { %v569_v44 = vadd.f32 %v567_v41, %v555_v52  ;;  %v1021_v41 = vld [vmem:[#allocation2] ss:$0 sm:$0xff] }
 0x3fb   :  { %v583_v60 = vadd.f32 %v581_v55, %v569_v44 }
 0x3fc   :  { %v523_v50 = vpop.xlane.xlu1 %522 }
 0x3fd   :  { %v526_v51 = vmul.f32 %v524_v18, %v523_v50  ;;  %v650_v50 = vperm.slane %v1581_v28, 4 }
 0x3ff   :  { %v528_v57 = vadd.f32 %v526_v51, %v514_v15  ;;  %v651_v53 = vmul.f32 %v650_v50, %v646_v62  ;;  %v663_v44 = vpop.xlane.xlu0 %662  ;;  %v677_v15 = vpop.xlane.xlu2 %676 }
 0x401   :  { %v542_v34 = vadd.f32 %v540_v26, %v528_v57 }
 0x403   :  { %v556_v1 = vadd.f32 %v554_v8, %v542_v34 }
 0x404   :  { %v565_v27 = vpop.xlane.xlu1 %564 }
 0x405   :  { %v568_v61 = vmul.f32 %v566_v35, %v565_v27  ;;  %v692_v27 = vperm.slane %v1581_v28, 7  ;;  %v666_v28 = vmul.f32 %v664_v29, %v663_v44 }
 0x407   :  { %v570_v18 = vadd.f32 %v568_v61, %v556_v1  ;;  %v693_v24 = vmul.f32 %v692_v27, %v688_v23 }
 0x409   :  { %v584_v3 = vadd.f32 %v582_v22, %v570_v18 }
 0x40b   :  { %v598_v33 = vadd.f32 %v596_v25, %v584_v3 }
 0x40c   :  { %v590_v12 = vpop.xlane.xlu1 %589 }
 0x40d   :  { %v595_v56 = vmul.f32 %v594_v45, %v590_v12  ;;  %v638_v12 = vmul.f32 %v636_v31, %v635_v32  ;;  %v810_v32 = vld [vmem:[%s1644_s8 + $0x10] sm:$0xff] }
 0x40f   :  { %v597_v63 = vadd.f32 %v595_v56, %v583_v60 }
 0x411   :  { %v611_v10 = vadd.f32 %v609_v7, %v597_v63 }
 0x413   :  { %v625_v19 = vadd.f32 %v623_v49, %v611_v10 }
 0x414   :  { %v632_v42 = vpop.xlane.xlu1 %631 }
 0x415   :  { %v637_v17 = vmul.f32 %v636_v31, %v632_v42 }
 0x417   :  { %v639_v2 = vadd.f32 %v637_v17, %v625_v19 }
 0x419   :  { %v653_v30 = vadd.f32 %v651_v53, %v639_v2 }
 0x41b   :  { %v667_v36 = vadd.f32 %v665_v38, %v653_v30  ;;  %v809_v38 = vld [vmem:[%s1644_s8 + $0x8] sm:$0xff] }
 0x41c   :  { %v607_v21 = vpop.xlane.xlu1 %606 }
 0x41d   :  { %v610_v4 = vmul.f32 %v608_v54, %v607_v21  ;;  %v680_v54 = vmul.f32 %v678_v47, %v677_v15 }
 0x41f   :  { %v612_v35 = vadd.f32 %v610_v4, %v598_v33 }
 0x421   :  { %v626_v39 = vadd.f32 %v624_v37, %v612_v35 }
 0x423   :  { %v640_v51 = vadd.f32 %v638_v12, %v626_v39 }
 0x424   :  { %v674_v11 = vpop.xlane.xlu1 %673 }
 0x425   :  { %v679_v9 = vmul.f32 %v678_v47, %v674_v11 }
 0x427   :  { %v681_v52 = vadd.f32 %v679_v9, %v667_v36  ;;  %v808_v9 = vld [vmem:[%s1644_s8] sm:$0xff] }
 0x429   :  { %v695_v43 = vadd.f32 %v693_v24, %v681_v52  ;;  %v1023_v24 = vld [vmem:[%s1645_s9] ss:$0 sm:$0xff] }
 0x42b   :  { %v701_v40 = vadd.f32 %v1021_v41, %v695_v43 }
 0x42c   :  { %v649_v45 = vpop.xlane.xlu1 %648 }
 0x42d   :  { %v652_v13 = vmul.f32 %v650_v50, %v649_v45  ;;  %729 = vperm.xlu0 %1013, %v701_v40  }
 0x42f   :  { %v654_v55 = vadd.f32 %v652_v13, %v640_v51 }
 0x431   :  { %v668_v56 = vadd.f32 %v666_v28, %v654_v55 }
 0x433   :  { %v682_v60 = vadd.f32 %v680_v54, %v668_v56 }
 0x434   :  { %v691_v57 = vpop.xlane.xlu1 %690 }
 0x435   :  { %v694_v62 = vmul.f32 %v692_v27, %v691_v57 }
 0x437   :  { %v696_v26 = vadd.f32 %v694_v62, %v682_v60 }
 0x439   :  { %v702_v63 = vadd.f32 %v1021_v41, %v696_v26 }
 0x43a   :  { %v745_v34 = vpop.permute.xlu2 %744 }
 0x43b   :  { %734 = vperm.xlu1 %1012, %v702_v63  }
 0x43d   :  { %v724_v42 = vpop.f32.mrf.mxu3 }
 0x43e   :  { %v737_v58 = vperm.slane %v724_v42, 0 }
 0x49f   :  { %v730_v7 = vpop.permute.xlu0 %729 }
 0x4a0   :  { %v738_v8 = vadd.f32 %v737_v58, %v730_v7 }
 0x4a2   :  { %v747_v61 = vadd.f32 %v745_v34, %v738_v8 }
 0x4a4   :  { %v751_v31 = vmul.f32 0.2, %v747_v61  ;;  %vm749_vm8 = vcmp.gt.f32.partialorder %v747_v61, 0.0 }
 0x4a6   :  { %v753_v10 = vsel %vm749_vm8, %v747_v61, %v751_v31 }
 0x4a7   :  { %v755_v48 = vadd.f32 %v753_v10, %v1260_v46 }
 0x4a9   :  { %v757_v49 = vsel %vm80_vm0, %v755_v48, -inf }
 0x4aa   :  { %758 = vmax.xlane.f32.xlu2 %v757_v49 }
 0x4ad   :  { %v735_v1 = vpop.permute.xlu1 %734 }
 0x4ae   :  { %v739_v17 = vadd.f32 %v737_v58, %v735_v1 }
 0x4b0   :  { %v748_v50 = vadd.f32 %v745_v34, %v739_v17 }
 0x4b2   :  { %v752_v18 = vmul.f32 0.2, %v748_v50  ;;  %vm750_vm9 = vcmp.gt.f32.partialorder %v748_v50, 0.0 }
 0x4b4   :  { %v754_v19 = vsel %vm750_vm9, %v748_v50, %v752_v18 }
 0x4b5   :  { %v756_v0 = vadd.f32 %v754_v19, %v1277_v59  ;;  %v811_v59 = vld [vmem:[%s1644_s8 + $0x18] sm:$0xff]  ;;  %s1123_s8 = smov 127  }
 0x4b6   :  { %834 = vmatpush.msrb.mxu0 %v811_v59 }
 0x4b7   :  { %v760_v20 = vsel %vm80_vm0, %v756_v0, -inf }
 0x4b8   :  { %761 = vmax.xlane.f32.xlu1 %v760_v20  ;;  %835 = vmatpush.msrb.mxu0 %v810_v32 }
 0x4ba   :  { %836 = vmatpush.msrb.mxu0 %v809_v38 }
 0x4bc   :  { %837 = vmatpush.msrb.mxu0 %v808_v9 }
 0x51d   :  { %v759_v21 = vpop.xlane.xlu2 %758 }
 0x51e   :  { %v763_v22 = vsub.f32 %v755_v48, %v759_v21 }
 0x520   :  { %v765_v2 = vmul.f32 1.442695, %v763_v22 }
 0x522   :  { %1028 = vpow2.f32 %v765_v2 }
 0x528   :  { %v1029_v25 = vpop.eup %1028 }
 0x529   :  { %v769_v46 = vsel %vm80_vm0, %v1029_v25, 0.0 }
 0x52a   :  { %770 = vadd.xlane.f32.xlu0 %v769_v46 }
 0x52b   :  { %v762_v53 = vpop.xlane.xlu1 %761 }
 0x52c   :  { %v764_v29 = vsub.f32 %v756_v0, %v762_v53 }
 0x52e   :  { %v767_v3 = vmul.f32 1.442695, %v764_v29 }
 0x530   :  { %1030 = vpow2.f32 %v767_v3 }
 0x536   :  { %v1031_v30 = vpop.eup %1030 }
 0x537   :  { %v772_v4 = vsel %vm80_vm0, %v1031_v30, 0.0 }
 0x538   :  { %773 = vadd.xlane.f32.xlu2 %v772_v4 }
 0x59d   :  { %v771_v27 = vpop.xlane.xlu0 %770 }
 0x59e   :  { %1032 = vrcp.f32 %v771_v27 }
 0x5a4   :  { %v1033_v47 = vpop.eup %1032 }
 0x5a5   :  { %v777_v33 = vmul.f32 %v1033_v47, %v1029_v25 }
 0x5a7   :  { %994 = vmatmul.msk.f32.vlgmr.msrb.gmra.mxu3 %vm80_vm0, %v777_v33  ;;  %898 = vst.msk [vmem:[#allocation4] sm:$0xff] %vm80_vm0, %v777_v33 }
 0x5ab   :  { %v774_v11 = vpop.xlane.xlu2 %773 }
 0x5ac   :  { %1034 = vrcp.f32 %v774_v11 }
 0x5b2   :  { %v1035_v35 = vpop.eup %1034 }
 0x5b3   :  { %v778_v36 = vmul.f32 %v1035_v35, %v1031_v30 }
 0x5b5   :  { %995 = vmatmul.msk.f32.gmra.mxu3 %vm80_vm0, %v778_v36  ;;  %899 = vst.msk [vmem:[#allocation4 + $0x8] sm:$0xff] %vm80_vm0, %v778_v36 }
 0x5b6   :  { %948 = dma.vmem_to_hbm [thread:$0]  %s941_s21, 256, %s943_s24, [#allocation5], %s1125_s2, %s1125_s2, %s1126_s3  }
 0x62a   :  { %v802_v23 = vpop.f32.mrf.mxu3 }
 0x62b   :  { %900 = vst.msk [vmem:[#allocation6] sm:$0xff] %vm136_vm1, %v802_v23  ;;  %996 = vmatmul.msk.f32.vlgmr.msrb.gmra.mxu0 %vm136_vm1, %v802_v23 }
 0x638   :  { %v805_v37 = vpop.f32.mrf.mxu3 }
 0x639   :  { %901 = vst.msk [vmem:[#allocation6 + $0x8] sm:$0xff] %vm136_vm1, %v805_v37  ;;  %997 = vmatmul.msk.f32.gmra.mxu0 %vm136_vm1, %v805_v37 }
 0x63a   :  { %961 = dma.vmem_to_hbm [thread:$0]  %s954_s0, 256, %s956_s18, [#allocation7], %s1125_s2, %s1125_s2, %s1126_s3  }
 0x6a8   :  { %v839_v52 = vpop.f32.mrf.mxu0 }
 0x6a9   :  { %v840_v41 = vadd.f32 %v1023_v24, %v839_v52 }
 0x6ab   :  { %880 = vrot.lane.b32.xlu2 %v840_v41, %s1122_s16  ;;  %v845_v51 = vmul.f32 %v840_v41, %v1246_v14 }
 0x6b6   :  { %v842_v39 = vpop.f32.mrf.mxu0 }
 0x6b7   :  { %v843_v43 = vadd.f32 %v1023_v24, %v842_v39 }
 0x6b9   :  { %882 = vrot.lane.b32.xlu0 %v843_v43, %s1122_s16  ;;  %v1015_v12 = vpack.i.bf16 %v840_v41, %v843_v43  ;;  %v846_v57 = vmul.f32 %v843_v43, %v1249_v16 }
 0x6bb   :  { %1016 = vrot.lane.b32.xlu1 %v1015_v12, %s1123_s8 }
 0x705   :  { %v881_v55 = vpop.permute.xlu2 %880 }
 0x72b   :  { %v883_v26 = vpop.permute.xlu0 %882 }
 0x72d   :  { %v1017_v40 = vpop.permute.xlu1 %1016 }
 0x72e   :  { %v1018_v44 = vunpack.i.l.bf16 %v1017_v40  ;;  %v1019_v45 = vunpack.i.h.bf16 %v1017_v40 }
 0x730   :  { %869 = vmatpush.msrb.mxu2 %v1018_v44 }
 0x732   :  { %870 = vmatpush.msrb.mxu2 %v1019_v45 }
 0x733   :  { %998 = vmatmul.msk.f32.vlgmr.msrb.gmra.mxu2 %vm80_vm0, %v1212_v5 }
 0x73b   :  { %999 = vmatmul.msk.f32.gmra.mxu2 %vm80_vm0, %v1216_v6 }
 0x7b6   :  { %v872_v13 = vpop.f32.mrf.mxu2 }
 0x7b7   :  { %v878_v28 = vsub.f32 %v845_v51, %v872_v13 }
 0x7b9   :  { %v886_v15 = vadd.f32 %v881_v55, %v878_v28 }
 0x7bb   :  { %v888_v56 = vsub.f32 0.0, %v886_v15 }
 0x7bd   :  { %v890_v54 = vmul.f32 1.442695, %v888_v56 }
 0x7be   :  { %v875_v60 = vpop.f32.mrf.mxu2 }
 0x7bf   :  { %1036 = vpow2.f32 %v890_v54  ;;  %v879_v62 = vsub.f32 %v846_v57, %v875_v60 }
 0x7c1   :  { %v887_v63 = vadd.f32 %v883_v26, %v879_v62 }
 0x7c3   :  { %v889_v42 = vsub.f32 0.0, %v887_v63 }
 0x7c5   :  { %v1037_v5 = vpop.eup %1036  ;;  %v892_v58 = vmul.f32 1.442695, %v889_v42 }
 0x7c6   :  { %v894_v7 = vadd.f32 1.0, %v1037_v5 }
 0x7c7   :  { %1038 = vpow2.f32 %v892_v58 }
 0x7c8   :  { %1040 = vrcp.f32 %v894_v7 }
 0x7cd   :  { %v1039_v6 = vpop.eup %1038 }
 0x7ce   :  { %v1041_v14 = vpop.eup %1040  ;;  %v895_v34 = vadd.f32 1.0, %v1039_v6 }
 0x7cf   :  { %902 = vxpose.xlu1.b32.start [1/2] (short) (narrow) %v1041_v14, 8 }
 0x7d0   :  { %1042 = vrcp.f32 %v895_v34 }
 0x7d6   :  { %v1043_v8 = vpop.eup %1042 }
 0x7d7   :  { %903 = vxpose.xlu1.b32.end [2/2] (short) (narrow) %v1043_v8, 8 }
 0x873   :  { %v918_v16 = vpop.trf.xlu1 }
 0x874   :  { %935 = vst.msk [vmem:[#allocation8] sm:$0x1] %vm934_vm10, %v918_v16 }
 0x875   :  { %972 = dma.vmem_to_hbm [thread:$0]  %s968_s26, 16, %s970_s5, [#allocation7]  }
 0x876   :  { %1116 = dma.done.wait [#allocation5], 256  }
 0x877   :  { %1117 = vsyncadd [#allocation5], 4294967040 }
 0x878   :  { %1118 = dma.done.wait [#allocation7], 272  }
 0x879   :  { %1119 = vsyncadd [#allocation7], 4294967024 }
 0x87a   :  { %985 = vsyncpa [#allocation5], 1 }
 0x87b   :  { %986 = vsyncpa [#allocation7], 1 }

</bundles_post_ra>
